<compile_context>
chip_gen: v7x
topology: tpu7x:2x2x1
jax: 0.10.0
libtpu: 0.0.40
codegen_flags: <defaults>
</compile_context>

<pallas_src>
import functools
import math

import jax
import jax.numpy as jnp
from jax.experimental import pallas as pl
from jax.experimental.pallas import tpu as pltpu


# ------------------------------- helpers ----------------------------------- #

def _round_up(x, m):
    return (x + m - 1) // m * m


def _pick_time_chunk(seq_len, hidden_pad, max_chunk):
    """Time-chunk size.  Capped for vreg pressure when Hp is large."""
    if hidden_pad >= 1024:
        max_chunk = min(max_chunk, 4)
    elif hidden_pad >= 512:
        max_chunk = min(max_chunk, 8)
    return max(1, min(max_chunk, seq_len))


def _pack_gate_weights(wi, wh, bi, bh, hidden, hidden_pad, in_feat_pad, mxu_dtype):
    """Lay the i/f/c/o gate blocks out 128-lane aligned with zero padding.

    Returns
      wiT_p: (in_feat_pad, 4*Hp)  columns for gate g live at [g*Hp, g*Hp + H)
      whT_p: (Hp, 4*Hp)           rows [H:Hp) zero, same column layout
      b_p:   (4*Hp,)              combined bi+bh, same column layout (f32)

    Zero padding guarantees padded hidden lanes stay exactly 0 through the
    recurrence (gate preact 0 -> i=f=o=0.5, c_gate=0 -> c_pad=0, h_pad=0),
    and zero Wi rows [in_feat:in_feat_pad) let the next layer consume the
    padded h_seq directly.
    """
    H, Hp = hidden, hidden_pad
    in_feat = wi.shape[1]
    wiT = wi.T.astype(jnp.float32)          # (in_feat, 4H)
    whT = wh.T.astype(jnp.float32)          # (H, 4H)
    b = (bi + bh).astype(jnp.float32)       # (4H,)

    wiT_p = jnp.zeros((in_feat_pad, 4 * Hp), jnp.float32)
    whT_p = jnp.zeros((Hp, 4 * Hp), jnp.float32)
    b_p = jnp.zeros((4 * Hp,), jnp.float32)
    for g in range(4):
        wiT_p = wiT_p.at[:in_feat, g * Hp:g * Hp + H].set(wiT[:, g * H:(g + 1) * H])
        whT_p = whT_p.at[:H, g * Hp:g * Hp + H].set(whT[:, g * H:(g + 1) * H])
        b_p = b_p.at[g * Hp:g * Hp + H].set(b[g * H:(g + 1) * H])
    return wiT_p.astype(mxu_dtype), whT_p.astype(mxu_dtype), b_p


# ----------------------------- Pallas kernel ------------------------------- #

def _lstm_rec_kernel(gx_ref, whT_ref, hseq_ref, hfin_ref, cfin_ref, h_sc, c_sc,
                     *, hidden_pad, t_chunk):
    """One time-chunk of the LSTM recurrence.

    gx_ref:   (T_CHUNK, bs_p, 4*Hp)  precomputed X@Wi.T + bias (gate-padded)
    whT_ref:  (Hp, 4*Hp)             recurrent weights (resident, single-buffered)
    hseq_ref: (T_CHUNK, bs_p, Hp)    h for every step in the chunk
    hfin_ref: (bs_p, Hp) f32         final hidden state (written last chunk)
    cfin_ref: (bs_p, Hp) f32         final cell state   (written last chunk)
    h_sc/c_sc:(bs_p, Hp) f32         recurrent state, persistent scratch
    """
    chunk = pl.program_id(0)

    @pl.when(chunk == 0)
    def _():
        h_sc[...] = jnp.zeros_like(h_sc)
        c_sc[...] = jnp.zeros_like(c_sc)

    Hp = hidden_pad
    whT = whT_ref[...]
    mxu_dtype = whT.dtype

    h = h_sc[...]
    c = c_sc[...]

    # Fully unrolled inner time loop (static t_chunk): the flat instruction
    # stream lets the scheduler overlap EUP gate activations of step t with the
    # MXU h@Wh.T of step t and the VMEM store of step t-1's h.
    for t in range(t_chunk):
        gates = gx_ref[t].astype(jnp.float32) + jnp.dot(
            h.astype(mxu_dtype), whT, preferred_element_type=jnp.float32)
        # gate order i, f, c, o — each gate is a lane-aligned Hp-wide block.
        i_g = jax.nn.sigmoid(gates[:, 0 * Hp:1 * Hp])
        f_g = jax.nn.sigmoid(gates[:, 1 * Hp:2 * Hp])
        c_g = jnp.tanh(gates[:, 2 * Hp:3 * Hp])
        o_g = jax.nn.sigmoid(gates[:, 3 * Hp:4 * Hp])
        c = f_g * c + i_g * c_g
        h = o_g * jnp.tanh(c)
        hseq_ref[t] = h.astype(hseq_ref.dtype)

    h_sc[...] = h
    c_sc[...] = c

    @pl.when(chunk == pl.num_programs(0) - 1)
    def _():
        hfin_ref[...] = h.astype(hfin_ref.dtype)
        cfin_ref[...] = c.astype(cfin_ref.dtype)


def _lstm_layer_recurrence(gates_x_p, whT_p, *, t_chunk, stream_dtype):
    """Run the recurrence over the whole (padded) sequence for one layer.

    gates_x_p: (seq_pad, bs_p, 4*Hp) stream_dtype, whT_p: (Hp, 4*Hp)
    returns: h_seq_p (seq_pad, bs_p, Hp) stream_dtype,
             h_fin_p (bs_p, Hp) f32, c_fin_p (bs_p, Hp) f32
    """
    seq_pad, bs_p, four_hp = gates_x_p.shape
    Hp = four_hp // 4
    n_chunks = seq_pad // t_chunk

    kernel = functools.partial(_lstm_rec_kernel, hidden_pad=Hp, t_chunk=t_chunk)

    # Tight VMEM budget: double-buffered streaming blocks + single-buffered
    # resident weights + resident state/final blocks.  Capped under v7x's
    # 64 MiB physical VMEM.
    sb = jnp.dtype(stream_dtype).itemsize
    gx_blk = t_chunk * bs_p * four_hp * sb
    hs_blk = t_chunk * bs_p * Hp * sb
    wh_bytes = Hp * four_hp * whT_p.dtype.itemsize     # Buffered(1): one copy
    state = bs_p * Hp * 4
    need = 2 * gx_blk + 2 * hs_blk + wh_bytes + 4 * state
    vmem_limit = int(min(max(int(1.4 * need) + (1 << 20), 16 << 20), 56 << 20))

    h_seq_p, h_fin_p, c_fin_p = pl.pallas_call(
        kernel,
        out_shape=(jax.ShapeDtypeStruct((seq_pad, bs_p, Hp), stream_dtype),
                   jax.ShapeDtypeStruct((bs_p, Hp), jnp.float32),
                   jax.ShapeDtypeStruct((bs_p, Hp), jnp.float32)),
        grid_spec=pltpu.PrefetchScalarGridSpec(
            num_scalar_prefetch=0,
            grid=(n_chunks,),
            in_specs=[
                # per-chunk precomputed input gates, lane-dense last dims
                pl.BlockSpec((t_chunk, bs_p, four_hp), lambda k: (k, 0, 0)),
                # recurrent weights: constant block index -> resident; the block
                # never changes so a single buffer suffices (halves weight VMEM).
                pl.BlockSpec((Hp, four_hp), lambda k: (0, 0),
                             pipeline_mode=pl.Buffered(1)),
            ],
            out_specs=(
                pl.BlockSpec((t_chunk, bs_p, Hp), lambda k: (k, 0, 0)),
                pl.BlockSpec((bs_p, Hp), lambda k: (0, 0)),
                pl.BlockSpec((bs_p, Hp), lambda k: (0, 0)),
            ),
            scratch_shapes=[pltpu.VMEM((bs_p, Hp), jnp.float32),   # h state
                            pltpu.VMEM((bs_p, Hp), jnp.float32)],  # c state
        ),
        compiler_params=pltpu.CompilerParams(
            dimension_semantics=("arbitrary",),      # sequential recurrence
            vmem_limit_bytes=vmem_limit),
    )(gates_x_p, whT_p)
    return h_seq_p, h_fin_p, c_fin_p


# ------------------------------ JAX wrapper --------------------------------- #

def lstm_forward(x, params, *, mxu_dtype=jnp.float32, max_time_chunk=32):
    """Matches PyTorch LSTM.forward semantics (use_ext=False math, zero init state).

    x: (bs, seq, in_size) f32
    params: list of (Wi, Wh, bi, bh) per layer (PyTorch shapes)
    returns: out (bs, seq, H), (h_n (layers, bs, H), c_n (layers, bs, H))
    """
    bs, seq, _ = x.shape
    H = params[0][1].shape[1]
    Hp = _round_up(H, 128)          # lane-aligned per-gate hidden
    bs_p = _round_up(bs, 8)         # sublane-aligned batch
    four_hp = 4 * Hp

    exact_f32 = jnp.dtype(mxu_dtype) == jnp.dtype(jnp.float32)
    stream_dtype = jnp.float32 if exact_f32 else jnp.bfloat16
    sb = jnp.dtype(stream_dtype).itemsize

    # Time chunk: vreg-pressure cap, then shrink until the double-buffered
    # streamed blocks fit a conservative VMEM budget.
    t_chunk = _pick_time_chunk(seq, Hp, max_time_chunk)
    while t_chunk > 1 and 2 * t_chunk * bs_p * (four_hp + Hp) * sb > (40 << 20):
        t_chunk = (t_chunk + 1) // 2
    seq_pad = _round_up(seq, t_chunk)
    pad_t = seq_pad - seq

    # Pad the input ONCE: batch -> bs_p, front time pad -> seq_pad.  Padded time
    # rows are exactly zero (and the bias is masked off on them below), so
    # h = c = 0 holds through the pad steps in every layer.
    x_p = jnp.pad(x, ((0, bs_p - bs), (pad_t, 0), (0, 0)))
    tmask = ((jnp.arange(seq_pad) >= pad_t).astype(jnp.float32)
             if pad_t else None)

    cur = None                      # padded time-major (seq_pad, bs_p, Hp)
    h_finals, c_finals = [], []
    for layer_idx, (wi, wh, bi, bh) in enumerate(params):
        in_feat_pad = wi.shape[1] if layer_idx == 0 else Hp
        wiT_p, whT_p, b_p = _pack_gate_weights(
            wi, wh, bi, bh, H, Hp, in_feat_pad, mxu_dtype)

        # Hoisted input projection: one big matmul per layer, time-major output.
        if layer_idx == 0:
            gx = jnp.einsum('bti,ig->tbg', x_p.astype(mxu_dtype), wiT_p,
                            preferred_element_type=jnp.float32)
        else:
            gx = jnp.einsum('tbh,hg->tbg', cur.astype(mxu_dtype), wiT_p,
                            preferred_element_type=jnp.float32)
        if tmask is None:
            gx = gx + b_p[None, None, :]
        else:
            gx = gx + b_p[None, None, :] * tmask[:, None, None]
        gx = gx.astype(stream_dtype)

        h_seq_p, h_fin_p, c_fin_p = _lstm_layer_recurrence(
            gx, whT_p, t_chunk=t_chunk, stream_dtype=stream_dtype)

        cur = h_seq_p                                   # stays padded, time-major
        h_finals.append(h_fin_p[:bs, :H])
        c_finals.append(c_fin_p[:bs, :H])

    # Single slice + transpose at the very end.
    out = jnp.transpose(cur[pad_t:, :bs, :H].astype(jnp.float32), (1, 0, 2))
    h_n = jnp.stack(h_finals, axis=0)                   # (layer_num, bs, H)
    c_n = jnp.stack(c_finals, axis=0)                   # (layer_num, bs, H)
    return out, (h_n, c_n)


# ---------------------- pure-JAX reference (for check) ---------------------- #

def lstm_forward_ref(x, params):
    bs, seq, _ = x.shape
    cur = x
    h_finals, c_finals = [], []
    for (wi, wh, bi, bh) in params:
        H = wh.shape[1]
        h = jnp.zeros((bs, H), jnp.float32)
        c = jnp.zeros((bs, H), jnp.float32)
        outs = []
        for i in range(seq):
            xt = cur[:, i, :]
            gates = xt @ wi.T + bi + h @ wh.T + bh
            i_g = jax.nn.sigmoid(gates[:, 0 * H:1 * H])
            f_g = jax.nn.sigmoid(gates[:, 1 * H:2 * H])
            c_g = jnp.tanh(gates[:, 2 * H:3 * H])
            o_g = jax.nn.sigmoid(gates[:, 3 * H:4 * H])
            c = f_g * c + i_g * c_g
            h = o_g * jnp.tanh(c)
            outs.append(h)
        cur = jnp.stack(outs, axis=1)
        h_finals.append(h)
        c_finals.append(c)
    return cur, (jnp.stack(h_finals, 0), jnp.stack(c_finals, 0))


# ------------------------------ param init ---------------------------------- #

def init_params(key, input_size, hidden_size, layer_num):
    params = []
    stdv = 1.0 / math.sqrt(hidden_size) if hidden_size > 0 else 0.0
    for layer in range(layer_num):
        in_sz = input_size if layer == 0 else hidden_size
        key, k1, k2, k3, k4 = jax.random.split(key, 5)
        wi = jax.random.uniform(k1, (4 * hidden_size, in_sz),
                                jnp.float32, -stdv, stdv)
        wh = jax.random.uniform(k2, (4 * hidden_size, hidden_size),
                                jnp.float32, -stdv, stdv)
        bi = jax.random.uniform(k3, (4 * hidden_size,), jnp.float32, -stdv, stdv)
        bh = jax.random.uniform(k4, (4 * hidden_size,), jnp.float32, -stdv, stdv)
        params.append((wi, wh, bi, bh))
    return params


# ---------------------------------- main ------------------------------------ #

if __name__ == "__main__":
    key = jax.random.PRNGKey(0)

    # Case 1: module-spec-sized shapes (single chunk, exact f32 check).
    bs, seq, input_size, hidden_size, layer_num = 2, 8, 16, 32, 2
    key, kx = jax.random.split(key)
    x = jax.random.normal(kx, (bs, seq, input_size), jnp.float32)
    params = init_params(key, input_size, hidden_size, layer_num)

    fwd = jax.jit(functools.partial(lstm_forward, mxu_dtype=jnp.float32))
    out, (h_n, c_n) = fwd(x, params)
    jax.block_until_ready((out, h_n, c_n))

    out_r, (h_r, c_r) = lstm_forward_ref(x, params)
    assert out.shape == (bs, seq, hidden_size)
    assert h_n.shape == (layer_num, bs, hidden_size)
    assert c_n.shape == (layer_num, bs, hidden_size)
    assert jnp.allclose(out, out_r, rtol=1e-5, atol=1e-5)
    assert jnp.allclose(h_n, h_r, rtol=1e-5, atol=1e-5)
    assert jnp.allclose(c_n, c_r, rtol=1e-5, atol=1e-5)

    # Case 2: exercises the multi-chunk state carry, front time padding
    # (seq not a multiple of t_chunk), and non-aligned batch/hidden padding.
    bs2, seq2, in2, hid2, ln2 = 3, 37, 20, 48, 2
    key, kx2 = jax.random.split(key)
    x2 = jax.random.normal(kx2, (bs2, seq2, in2), jnp.float32)
    params2 = init_params(key, in2, hid2, ln2)

    fwd2 = jax.jit(functools.partial(lstm_forward, mxu_dtype=jnp.float32,
                                     max_time_chunk=8))
    out2, (h2, c2) = fwd2(x2, params2)
    jax.block_until_ready((out2, h2, c2))

    out2_r, (h2_r, c2_r) = lstm_forward_ref(x2, params2)
    assert out2.shape == (bs2, seq2, hid2)
    assert jnp.allclose(out2, out2_r, rtol=1e-4, atol=1e-4)
    assert jnp.allclose(h2, h2_r, rtol=1e-4, atol=1e-4)
    assert jnp.allclose(c2, c2_r, rtol=1e-4, atol=1e-4)

    print("KERNEL_OK")
</pallas_src>

<mosaic_0001>
module attributes {stable_mosaic.version = 11 : i64} {
  func.func @_lstm_rec_kernel(%arg0: i32, %arg1: memref<8x8x512xf32, #tpu.memory_space<vmem>>, %arg2: memref<128x512xf32, #tpu.memory_space<vmem>>, %arg3: memref<8x8x128xf32, #tpu.memory_space<vmem>>, %arg4: memref<8x128xf32, #tpu.memory_space<vmem>>, %arg5: memref<8x128xf32, #tpu.memory_space<vmem>>, %arg6: memref<8x128xf32, #tpu.memory_space<vmem>>, %arg7: memref<8x128xf32, #tpu.memory_space<vmem>>) attributes {dimension_semantics = [#tpu.dimension_semantics<arbitrary>], iteration_bounds = array<i64: 1>, scalar_prefetch = 0 : i64, scratch_operands = 2 : i64, tpu.core_type = #tpu.core_type<tc>, window_params = [{transform_indices = @transform_0, window_bounds = array<i64: 8, 8, 512>}, {pipeline_mode = #tpu.pipeline_mode<synchronous>, transform_indices = @transform_1, window_bounds = array<i64: 128, 512>}, {transform_indices = @transform_2, window_bounds = array<i64: 8, 8, 128>}, {pipeline_mode = #tpu.pipeline_mode<synchronous>, transform_indices = @transform_3, window_bounds = array<i64: 8, 128>}, {pipeline_mode = #tpu.pipeline_mode<synchronous>, transform_indices = @transform_4, window_bounds = array<i64: 8, 128>}]} {
    %c0_i32 = arith.constant 0 : i32
    %0 = arith.cmpi eq, %arg0, %c0_i32 : i32
    %1 = arith.extui %0 : i1 to i32
    %c0_i32_0 = arith.constant 0 : i32
    %2 = arith.cmpi ne, %1, %c0_i32_0 : i32
    scf.if %2 {
      %cst_84 = arith.constant 0.000000e+00 : f32
      %267 = vector.broadcast %cst_84 : f32 to vector<8x128xf32>
      %c0_85 = arith.constant 0 : index
      %c0_86 = arith.constant 0 : index
      %268 = vector.load %arg6[%c0_85, %c0_86] : memref<8x128xf32, #tpu.memory_space<vmem>>, vector<8x128xf32>
      tpu.vector_store %arg6[%c0_85, %c0_86], %267 {strides = array<i32>} : memref<8x128xf32, #tpu.memory_space<vmem>>, vector<8x128xf32>,
      %cst_87 = arith.constant 0.000000e+00 : f32
      %269 = vector.broadcast %cst_87 : f32 to vector<8x128xf32>
      %c0_88 = arith.constant 0 : index
      %c0_89 = arith.constant 0 : index
      %270 = vector.load %arg7[%c0_88, %c0_89] : memref<8x128xf32, #tpu.memory_space<vmem>>, vector<8x128xf32>
      tpu.vector_store %arg7[%c0_88, %c0_89], %269 {strides = array<i32>} : memref<8x128xf32, #tpu.memory_space<vmem>>, vector<8x128xf32>,
    } else {
    }
    %c0 = arith.constant 0 : index
    %c0_1 = arith.constant 0 : index
    %3 = vector.load %arg2[%c0, %c0_1] : memref<128x512xf32, #tpu.memory_space<vmem>>, vector<128x512xf32>
    %c0_2 = arith.constant 0 : index
    %c0_3 = arith.constant 0 : index
    %4 = vector.load %arg6[%c0_2, %c0_3] : memref<8x128xf32, #tpu.memory_space<vmem>>, vector<8x128xf32>
    %c0_4 = arith.constant 0 : index
    %c0_5 = arith.constant 0 : index
    %5 = vector.load %arg7[%c0_4, %c0_5] : memref<8x128xf32, #tpu.memory_space<vmem>>, vector<8x128xf32>
    %c0_6 = arith.constant 0 : index
    %c0_7 = arith.constant 0 : index
    %c0_8 = arith.constant 0 : index
    %6 = vector.load %arg1[%c0_6, %c0_7, %c0_8] : memref<8x8x512xf32, #tpu.memory_space<vmem>>, vector<1x8x512xf32>
    %7 = vector.shape_cast %6 : vector<1x8x512xf32> to vector<8x512xf32>
    %cst = arith.constant dense<0.000000e+00> : vector<8x512xf32>
    %8 = tpu.matmul %4, %3, %cst {dimension_numbers = #tpu.dot_dimension_numbers<[1], [0], [0], [1], [0, 0, 1, 1], [], []>} : vector<8x128xf32>, vector<128x512xf32>, vector<8x512xf32> -> vector<8x512xf32>
    %9 = arith.addf %7, %8 : vector<8x512xf32>
    %10 = vector.extract_strided_slice %9 {offsets = [0, 0], sizes = [8, 128], strides = [1, 1]} : vector<8x512xf32> to vector<8x128xf32>
    %11 = arith.negf %10 : vector<8x128xf32>
    %12 = math.exp %11 : vector<8x128xf32>
    %cst_9 = arith.constant 1.000000e+00 : f32
    %13 = vector.broadcast %cst_9 : f32 to vector<8x128xf32>
    %14 = arith.addf %13, %12 : vector<8x128xf32>
    %15 = arith.divf %13, %14 : vector<8x128xf32>
    %16 = vector.extract_strided_slice %9 {offsets = [0, 128], sizes = [8, 128], strides = [1, 1]} : vector<8x512xf32> to vector<8x128xf32>
    %17 = arith.negf %16 : vector<8x128xf32>
    %18 = math.exp %17 : vector<8x128xf32>
    %cst_10 = arith.constant 1.000000e+00 : f32
    %19 = vector.broadcast %cst_10 : f32 to vector<8x128xf32>
    %20 = arith.addf %19, %18 : vector<8x128xf32>
    %21 = arith.divf %19, %20 : vector<8x128xf32>
    %22 = vector.extract_strided_slice %9 {offsets = [0, 256], sizes = [8, 128], strides = [1, 1]} : vector<8x512xf32> to vector<8x128xf32>
    %23 = math.tanh %22 : vector<8x128xf32>
    %24 = vector.extract_strided_slice %9 {offsets = [0, 384], sizes = [8, 128], strides = [1, 1]} : vector<8x512xf32> to vector<8x128xf32>
    %25 = arith.negf %24 : vector<8x128xf32>
    %26 = math.exp %25 : vector<8x128xf32>
    %cst_11 = arith.constant 1.000000e+00 : f32
    %27 = vector.broadcast %cst_11 : f32 to vector<8x128xf32>
    %28 = arith.addf %27, %26 : vector<8x128xf32>
    %29 = arith.divf %27, %28 : vector<8x128xf32>
    %30 = arith.mulf %21, %5 : vector<8x128xf32>
    %31 = arith.mulf %15, %23 : vector<8x128xf32>
    %32 = arith.addf %30, %31 : vector<8x128xf32>
    %33 = math.tanh %32 : vector<8x128xf32>
    %34 = arith.mulf %29, %33 : vector<8x128xf32>
    %c0_12 = arith.constant 0 : index
    %c0_13 = arith.constant 0 : index
    %c0_14 = arith.constant 0 : index
    %35 = vector.load %arg3[%c0_12, %c0_13, %c0_14] : memref<8x8x128xf32, #tpu.memory_space<vmem>>, vector<1x8x128xf32>
    %36 = vector.shape_cast %35 : vector<1x8x128xf32> to vector<8x128xf32>
    %37 = vector.shape_cast %34 : vector<8x128xf32> to vector<1x8x128xf32>
    tpu.vector_store %arg3[%c0_12, %c0_13, %c0_14], %37 {strides = array<i32>} : memref<8x8x128xf32, #tpu.memory_space<vmem>>, vector<1x8x128xf32>,
    %c1 = arith.constant 1 : index
    %c0_15 = arith.constant 0 : index
    %c0_16 = arith.constant 0 : index
    %38 = vector.load %arg1[%c1, %c0_15, %c0_16] : memref<8x8x512xf32, #tpu.memory_space<vmem>>, vector<1x8x512xf32>
    %39 = vector.shape_cast %38 : vector<1x8x512xf32> to vector<8x512xf32>
    %cst_17 = arith.constant dense<0.000000e+00> : vector<8x512xf32>
    %40 = tpu.matmul %34, %3, %cst_17 {dimension_numbers = #tpu.dot_dimension_numbers<[1], [0], [0], [1], [0, 0, 1, 1], [], []>} : vector<8x128xf32>, vector<128x512xf32>, vector<8x512xf32> -> vector<8x512xf32>
    %41 = arith.addf %39, %40 : vector<8x512xf32>
    %42 = vector.extract_strided_slice %41 {offsets = [0, 0], sizes = [8, 128], strides = [1, 1]} : vector<8x512xf32> to vector<8x128xf32>
    %43 = arith.negf %42 : vector<8x128xf32>
    %44 = math.exp %43 : vector<8x128xf32>
    %cst_18 = arith.constant 1.000000e+00 : f32
    %45 = vector.broadcast %cst_18 : f32 to vector<8x128xf32>
    %46 = arith.addf %45, %44 : vector<8x128xf32>
    %47 = arith.divf %45, %46 : vector<8x128xf32>
    %48 = vector.extract_strided_slice %41 {offsets = [0, 128], sizes = [8, 128], strides = [1, 1]} : vector<8x512xf32> to vector<8x128xf32>
    %49 = arith.negf %48 : vector<8x128xf32>
    %50 = math.exp %49 : vector<8x128xf32>
    %cst_19 = arith.constant 1.000000e+00 : f32
    %51 = vector.broadcast %cst_19 : f32 to vector<8x128xf32>
    %52 = arith.addf %51, %50 : vector<8x128xf32>
    %53 = arith.divf %51, %52 : vector<8x128xf32>
    %54 = vector.extract_strided_slice %41 {offsets = [0, 256], sizes = [8, 128], strides = [1, 1]} : vector<8x512xf32> to vector<8x128xf32>
    %55 = math.tanh %54 : vector<8x128xf32>
    %56 = vector.extract_strided_slice %41 {offsets = [0, 384], sizes = [8, 128], strides = [1, 1]} : vector<8x512xf32> to vector<8x128xf32>
    %57 = arith.negf %56 : vector<8x128xf32>
    %58 = math.exp %57 : vector<8x128xf32>
    %cst_20 = arith.constant 1.000000e+00 : f32
    %59 = vector.broadcast %cst_20 : f32 to vector<8x128xf32>
    %60 = arith.addf %59, %58 : vector<8x128xf32>
    %61 = arith.divf %59, %60 : vector<8x128xf32>
    %62 = arith.mulf %53, %32 : vector<8x128xf32>
    %63 = arith.mulf %47, %55 : vector<8x128xf32>
    %64 = arith.addf %62, %63 : vector<8x128xf32>
    %65 = math.tanh %64 : vector<8x128xf32>
    %66 = arith.mulf %61, %65 : vector<8x128xf32>
    %c1_21 = arith.constant 1 : index
    %c0_22 = arith.constant 0 : index
    %c0_23 = arith.constant 0 : index
    %67 = vector.load %arg3[%c1_21, %c0_22, %c0_23] : memref<8x8x128xf32, #tpu.memory_space<vmem>>, vector<1x8x128xf32>
    %68 = vector.shape_cast %67 : vector<1x8x128xf32> to vector<8x128xf32>
    %69 = vector.shape_cast %66 : vector<8x128xf32> to vector<1x8x128xf32>
    tpu.vector_store %arg3[%c1_21, %c0_22, %c0_23], %69 {strides = array<i32>} : memref<8x8x128xf32, #tpu.memory_space<vmem>>, vector<1x8x128xf32>,
    %c2 = arith.constant 2 : index
    %c0_24 = arith.constant 0 : index
    %c0_25 = arith.constant 0 : index
    %70 = vector.load %arg1[%c2, %c0_24, %c0_25] : memref<8x8x512xf32, #tpu.memory_space<vmem>>, vector<1x8x512xf32>
    %71 = vector.shape_cast %70 : vector<1x8x512xf32> to vector<8x512xf32>
    %cst_26 = arith.constant dense<0.000000e+00> : vector<8x512xf32>
    %72 = tpu.matmul %66, %3, %cst_26 {dimension_numbers = #tpu.dot_dimension_numbers<[1], [0], [0], [1], [0, 0, 1, 1], [], []>} : vector<8x128xf32>, vector<128x512xf32>, vector<8x512xf32> -> vector<8x512xf32>
    %73 = arith.addf %71, %72 : vector<8x512xf32>
    %74 = vector.extract_strided_slice %73 {offsets = [0, 0], sizes = [8, 128], strides = [1, 1]} : vector<8x512xf32> to vector<8x128xf32>
    %75 = arith.negf %74 : vector<8x128xf32>
    %76 = math.exp %75 : vector<8x128xf32>
    %cst_27 = arith.constant 1.000000e+00 : f32
    %77 = vector.broadcast %cst_27 : f32 to vector<8x128xf32>
    %78 = arith.addf %77, %76 : vector<8x128xf32>
    %79 = arith.divf %77, %78 : vector<8x128xf32>
    %80 = vector.extract_strided_slice %73 {offsets = [0, 128], sizes = [8, 128], strides = [1, 1]} : vector<8x512xf32> to vector<8x128xf32>
    %81 = arith.negf %80 : vector<8x128xf32>
    %82 = math.exp %81 : vector<8x128xf32>
    %cst_28 = arith.constant 1.000000e+00 : f32
    %83 = vector.broadcast %cst_28 : f32 to vector<8x128xf32>
    %84 = arith.addf %83, %82 : vector<8x128xf32>
    %85 = arith.divf %83, %84 : vector<8x128xf32>
    %86 = vector.extract_strided_slice %73 {offsets = [0, 256], sizes = [8, 128], strides = [1, 1]} : vector<8x512xf32> to vector<8x128xf32>
    %87 = math.tanh %86 : vector<8x128xf32>
    %88 = vector.extract_strided_slice %73 {offsets = [0, 384], sizes = [8, 128], strides = [1, 1]} : vector<8x512xf32> to vector<8x128xf32>
    %89 = arith.negf %88 : vector<8x128xf32>
    %90 = math.exp %89 : vector<8x128xf32>
    %cst_29 = arith.constant 1.000000e+00 : f32
    %91 = vector.broadcast %cst_29 : f32 to vector<8x128xf32>
    %92 = arith.addf %91, %90 : vector<8x128xf32>
    %93 = arith.divf %91, %92 : vector<8x128xf32>
    %94 = arith.mulf %85, %64 : vector<8x128xf32>
    %95 = arith.mulf %79, %87 : vector<8x128xf32>
    %96 = arith.addf %94, %95 : vector<8x128xf32>
    %97 = math.tanh %96 : vector<8x128xf32>
    %98 = arith.mulf %93, %97 : vector<8x128xf32>
    %c2_30 = arith.constant 2 : index
    %c0_31 = arith.constant 0 : index
    %c0_32 = arith.constant 0 : index
    %99 = vector.load %arg3[%c2_30, %c0_31, %c0_32] : memref<8x8x128xf32, #tpu.memory_space<vmem>>, vector<1x8x128xf32>
    %100 = vector.shape_cast %99 : vector<1x8x128xf32> to vector<8x128xf32>
    %101 = vector.shape_cast %98 : vector<8x128xf32> to vector<1x8x128xf32>
    tpu.vector_store %arg3[%c2_30, %c0_31, %c0_32], %101 {strides = array<i32>} : memref<8x8x128xf32, #tpu.memory_space<vmem>>, vector<1x8x128xf32>,
    %c3 = arith.constant 3 : index
    %c0_33 = arith.constant 0 : index
    %c0_34 = arith.constant 0 : index
    %102 = vector.load %arg1[%c3, %c0_33, %c0_34] : memref<8x8x512xf32, #tpu.memory_space<vmem>>, vector<1x8x512xf32>
    %103 = vector.shape_cast %102 : vector<1x8x512xf32> to vector<8x512xf32>
    %cst_35 = arith.constant dense<0.000000e+00> : vector<8x512xf32>
    %104 = tpu.matmul %98, %3, %cst_35 {dimension_numbers = #tpu.dot_dimension_numbers<[1], [0], [0], [1], [0, 0, 1, 1], [], []>} : vector<8x128xf32>, vector<128x512xf32>, vector<8x512xf32> -> vector<8x512xf32>
    %105 = arith.addf %103, %104 : vector<8x512xf32>
    %106 = vector.extract_strided_slice %105 {offsets = [0, 0], sizes = [8, 128], strides = [1, 1]} : vector<8x512xf32> to vector<8x128xf32>
    %107 = arith.negf %106 : vector<8x128xf32>
    %108 = math.exp %107 : vector<8x128xf32>
    %cst_36 = arith.constant 1.000000e+00 : f32
    %109 = vector.broadcast %cst_36 : f32 to vector<8x128xf32>
    %110 = arith.addf %109, %108 : vector<8x128xf32>
    %111 = arith.divf %109, %110 : vector<8x128xf32>
    %112 = vector.extract_strided_slice %105 {offsets = [0, 128], sizes = [8, 128], strides = [1, 1]} : vector<8x512xf32> to vector<8x128xf32>
    %113 = arith.negf %112 : vector<8x128xf32>
    %114 = math.exp %113 : vector<8x128xf32>
    %cst_37 = arith.constant 1.000000e+00 : f32
    %115 = vector.broadcast %cst_37 : f32 to vector<8x128xf32>
    %116 = arith.addf %115, %114 : vector<8x128xf32>
    %117 = arith.divf %115, %116 : vector<8x128xf32>
    %118 = vector.extract_strided_slice %105 {offsets = [0, 256], sizes = [8, 128], strides = [1, 1]} : vector<8x512xf32> to vector<8x128xf32>
    %119 = math.tanh %118 : vector<8x128xf32>
    %120 = vector.extract_strided_slice %105 {offsets = [0, 384], sizes = [8, 128], strides = [1, 1]} : vector<8x512xf32> to vector<8x128xf32>
    %121 = arith.negf %120 : vector<8x128xf32>
    %122 = math.exp %121 : vector<8x128xf32>
    %cst_38 = arith.constant 1.000000e+00 : f32
    %123 = vector.broadcast %cst_38 : f32 to vector<8x128xf32>
    %124 = arith.addf %123, %122 : vector<8x128xf32>
    %125 = arith.divf %123, %124 : vector<8x128xf32>
    %126 = arith.mulf %117, %96 : vector<8x128xf32>
    %127 = arith.mulf %111, %119 : vector<8x128xf32>
    %128 = arith.addf %126, %127 : vector<8x128xf32>
    %129 = math.tanh %128 : vector<8x128xf32>
    %130 = arith.mulf %125, %129 : vector<8x128xf32>
    %c3_39 = arith.constant 3 : index
    %c0_40 = arith.constant 0 : index
    %c0_41 = arith.constant 0 : index
    %131 = vector.load %arg3[%c3_39, %c0_40, %c0_41] : memref<8x8x128xf32, #tpu.memory_space<vmem>>, vector<1x8x128xf32>
    %132 = vector.shape_cast %131 : vector<1x8x128xf32> to vector<8x128xf32>
    %133 = vector.shape_cast %130 : vector<8x128xf32> to vector<1x8x128xf32>
    tpu.vector_store %arg3[%c3_39, %c0_40, %c0_41], %133 {strides = array<i32>} : memref<8x8x128xf32, #tpu.memory_space<vmem>>, vector<1x8x128xf32>,
    %c4 = arith.constant 4 : index
    %c0_42 = arith.constant 0 : index
    %c0_43 = arith.constant 0 : index
    %134 = vector.load %arg1[%c4, %c0_42, %c0_43] : memref<8x8x512xf32, #tpu.memory_space<vmem>>, vector<1x8x512xf32>
    %135 = vector.shape_cast %134 : vector<1x8x512xf32> to vector<8x512xf32>
    %cst_44 = arith.constant dense<0.000000e+00> : vector<8x512xf32>
    %136 = tpu.matmul %130, %3, %cst_44 {dimension_numbers = #tpu.dot_dimension_numbers<[1], [0], [0], [1], [0, 0, 1, 1], [], []>} : vector<8x128xf32>, vector<128x512xf32>, vector<8x512xf32> -> vector<8x512xf32>
    %137 = arith.addf %135, %136 : vector<8x512xf32>
    %138 = vector.extract_strided_slice %137 {offsets = [0, 0], sizes = [8, 128], strides = [1, 1]} : vector<8x512xf32> to vector<8x128xf32>
    %139 = arith.negf %138 : vector<8x128xf32>
    %140 = math.exp %139 : vector<8x128xf32>
    %cst_45 = arith.constant 1.000000e+00 : f32
    %141 = vector.broadcast %cst_45 : f32 to vector<8x128xf32>
    %142 = arith.addf %141, %140 : vector<8x128xf32>
    %143 = arith.divf %141, %142 : vector<8x128xf32>
    %144 = vector.extract_strided_slice %137 {offsets = [0, 128], sizes = [8, 128], strides = [1, 1]} : vector<8x512xf32> to vector<8x128xf32>
    %145 = arith.negf %144 : vector<8x128xf32>
    %146 = math.exp %145 : vector<8x128xf32>
    %cst_46 = arith.constant 1.000000e+00 : f32
    %147 = vector.broadcast %cst_46 : f32 to vector<8x128xf32>
    %148 = arith.addf %147, %146 : vector<8x128xf32>
    %149 = arith.divf %147, %148 : vector<8x128xf32>
    %150 = vector.extract_strided_slice %137 {offsets = [0, 256], sizes = [8, 128], strides = [1, 1]} : vector<8x512xf32> to vector<8x128xf32>
    %151 = math.tanh %150 : vector<8x128xf32>
    %152 = vector.extract_strided_slice %137 {offsets = [0, 384], sizes = [8, 128], strides = [1, 1]} : vector<8x512xf32> to vector<8x128xf32>
    %153 = arith.negf %152 : vector<8x128xf32>
    %154 = math.exp %153 : vector<8x128xf32>
    %cst_47 = arith.constant 1.000000e+00 : f32
    %155 = vector.broadcast %cst_47 : f32 to vector<8x128xf32>
    %156 = arith.addf %155, %154 : vector<8x128xf32>
    %157 = arith.divf %155, %156 : vector<8x128xf32>
    %158 = arith.mulf %149, %128 : vector<8x128xf32>
    %159 = arith.mulf %143, %151 : vector<8x128xf32>
    %160 = arith.addf %158, %159 : vector<8x128xf32>
    %161 = math.tanh %160 : vector<8x128xf32>
    %162 = arith.mulf %157, %161 : vector<8x128xf32>
    %c4_48 = arith.constant 4 : index
    %c0_49 = arith.constant 0 : index
    %c0_50 = arith.constant 0 : index
    %163 = vector.load %arg3[%c4_48, %c0_49, %c0_50] : memref<8x8x128xf32, #tpu.memory_space<vmem>>, vector<1x8x128xf32>
    %164 = vector.shape_cast %163 : vector<1x8x128xf32> to vector<8x128xf32>
    %165 = vector.shape_cast %162 : vector<8x128xf32> to vector<1x8x128xf32>
    tpu.vector_store %arg3[%c4_48, %c0_49, %c0_50], %165 {strides = array<i32>} : memref<8x8x128xf32, #tpu.memory_space<vmem>>, vector<1x8x128xf32>,
    %c5 = arith.constant 5 : index
    %c0_51 = arith.constant 0 : index
    %c0_52 = arith.constant 0 : index
    %166 = vector.load %arg1[%c5, %c0_51, %c0_52] : memref<8x8x512xf32, #tpu.memory_space<vmem>>, vector<1x8x512xf32>
    %167 = vector.shape_cast %166 : vector<1x8x512xf32> to vector<8x512xf32>
    %cst_53 = arith.constant dense<0.000000e+00> : vector<8x512xf32>
    %168 = tpu.matmul %162, %3, %cst_53 {dimension_numbers = #tpu.dot_dimension_numbers<[1], [0], [0], [1], [0, 0, 1, 1], [], []>} : vector<8x128xf32>, vector<128x512xf32>, vector<8x512xf32> -> vector<8x512xf32>
    %169 = arith.addf %167, %168 : vector<8x512xf32>
    %170 = vector.extract_strided_slice %169 {offsets = [0, 0], sizes = [8, 128], strides = [1, 1]} : vector<8x512xf32> to vector<8x128xf32>
    %171 = arith.negf %170 : vector<8x128xf32>
    %172 = math.exp %171 : vector<8x128xf32>
    %cst_54 = arith.constant 1.000000e+00 : f32
    %173 = vector.broadcast %cst_54 : f32 to vector<8x128xf32>
    %174 = arith.addf %173, %172 : vector<8x128xf32>
    %175 = arith.divf %173, %174 : vector<8x128xf32>
    %176 = vector.extract_strided_slice %169 {offsets = [0, 128], sizes = [8, 128], strides = [1, 1]} : vector<8x512xf32> to vector<8x128xf32>
    %177 = arith.negf %176 : vector<8x128xf32>
    %178 = math.exp %177 : vector<8x128xf32>
    %cst_55 = arith.constant 1.000000e+00 : f32
    %179 = vector.broadcast %cst_55 : f32 to vector<8x128xf32>
    %180 = arith.addf %179, %178 : vector<8x128xf32>
    %181 = arith.divf %179, %180 : vector<8x128xf32>
    %182 = vector.extract_strided_slice %169 {offsets = [0, 256], sizes = [8, 128], strides = [1, 1]} : vector<8x512xf32> to vector<8x128xf32>
    %183 = math.tanh %182 : vector<8x128xf32>
    %184 = vector.extract_strided_slice %169 {offsets = [0, 384], sizes = [8, 128], strides = [1, 1]} : vector<8x512xf32> to vector<8x128xf32>
    %185 = arith.negf %184 : vector<8x128xf32>
    %186 = math.exp %185 : vector<8x128xf32>
    %cst_56 = arith.constant 1.000000e+00 : f32
    %187 = vector.broadcast %cst_56 : f32 to vector<8x128xf32>
    %188 = arith.addf %187, %186 : vector<8x128xf32>
    %189 = arith.divf %187, %188 : vector<8x128xf32>
    %190 = arith.mulf %181, %160 : vector<8x128xf32>
    %191 = arith.mulf %175, %183 : vector<8x128xf32>
    %192 = arith.addf %190, %191 : vector<8x128xf32>
    %193 = math.tanh %192 : vector<8x128xf32>
    %194 = arith.mulf %189, %193 : vector<8x128xf32>
    %c5_57 = arith.constant 5 : index
    %c0_58 = arith.constant 0 : index
    %c0_59 = arith.constant 0 : index
    %195 = vector.load %arg3[%c5_57, %c0_58, %c0_59] : memref<8x8x128xf32, #tpu.memory_space<vmem>>, vector<1x8x128xf32>
    %196 = vector.shape_cast %195 : vector<1x8x128xf32> to vector<8x128xf32>
    %197 = vector.shape_cast %194 : vector<8x128xf32> to vector<1x8x128xf32>
    tpu.vector_store %arg3[%c5_57, %c0_58, %c0_59], %197 {strides = array<i32>} : memref<8x8x128xf32, #tpu.memory_space<vmem>>, vector<1x8x128xf32>,
    %c6 = arith.constant 6 : index
    %c0_60 = arith.constant 0 : index
    %c0_61 = arith.constant 0 : index
    %198 = vector.load %arg1[%c6, %c0_60, %c0_61] : memref<8x8x512xf32, #tpu.memory_space<vmem>>, vector<1x8x512xf32>
    %199 = vector.shape_cast %198 : vector<1x8x512xf32> to vector<8x512xf32>
    %cst_62 = arith.constant dense<0.000000e+00> : vector<8x512xf32>
    %200 = tpu.matmul %194, %3, %cst_62 {dimension_numbers = #tpu.dot_dimension_numbers<[1], [0], [0], [1], [0, 0, 1, 1], [], []>} : vector<8x128xf32>, vector<128x512xf32>, vector<8x512xf32> -> vector<8x512xf32>
    %201 = arith.addf %199, %200 : vector<8x512xf32>
    %202 = vector.extract_strided_slice %201 {offsets = [0, 0], sizes = [8, 128], strides = [1, 1]} : vector<8x512xf32> to vector<8x128xf32>
    %203 = arith.negf %202 : vector<8x128xf32>
    %204 = math.exp %203 : vector<8x128xf32>
    %cst_63 = arith.constant 1.000000e+00 : f32
    %205 = vector.broadcast %cst_63 : f32 to vector<8x128xf32>
    %206 = arith.addf %205, %204 : vector<8x128xf32>
    %207 = arith.divf %205, %206 : vector<8x128xf32>
    %208 = vector.extract_strided_slice %201 {offsets = [0, 128], sizes = [8, 128], strides = [1, 1]} : vector<8x512xf32> to vector<8x128xf32>
    %209 = arith.negf %208 : vector<8x128xf32>
    %210 = math.exp %209 : vector<8x128xf32>
    %cst_64 = arith.constant 1.000000e+00 : f32
    %211 = vector.broadcast %cst_64 : f32 to vector<8x128xf32>
    %212 = arith.addf %211, %210 : vector<8x128xf32>
    %213 = arith.divf %211, %212 : vector<8x128xf32>
    %214 = vector.extract_strided_slice %201 {offsets = [0, 256], sizes = [8, 128], strides = [1, 1]} : vector<8x512xf32> to vector<8x128xf32>
    %215 = math.tanh %214 : vector<8x128xf32>
    %216 = vector.extract_strided_slice %201 {offsets = [0, 384], sizes = [8, 128], strides = [1, 1]} : vector<8x512xf32> to vector<8x128xf32>
    %217 = arith.negf %216 : vector<8x128xf32>
    %218 = math.exp %217 : vector<8x128xf32>
    %cst_65 = arith.constant 1.000000e+00 : f32
    %219 = vector.broadcast %cst_65 : f32 to vector<8x128xf32>
    %220 = arith.addf %219, %218 : vector<8x128xf32>
    %221 = arith.divf %219, %220 : vector<8x128xf32>
    %222 = arith.mulf %213, %192 : vector<8x128xf32>
    %223 = arith.mulf %207, %215 : vector<8x128xf32>
    %224 = arith.addf %222, %223 : vector<8x128xf32>
    %225 = math.tanh %224 : vector<8x128xf32>
    %226 = arith.mulf %221, %225 : vector<8x128xf32>
    %c6_66 = arith.constant 6 : index
    %c0_67 = arith.constant 0 : index
    %c0_68 = arith.constant 0 : index
    %227 = vector.load %arg3[%c6_66, %c0_67, %c0_68] : memref<8x8x128xf32, #tpu.memory_space<vmem>>, vector<1x8x128xf32>
    %228 = vector.shape_cast %227 : vector<1x8x128xf32> to vector<8x128xf32>
    %229 = vector.shape_cast %226 : vector<8x128xf32> to vector<1x8x128xf32>
    tpu.vector_store %arg3[%c6_66, %c0_67, %c0_68], %229 {strides = array<i32>} : memref<8x8x128xf32, #tpu.memory_space<vmem>>, vector<1x8x128xf32>,
    %c7 = arith.constant 7 : index
    %c0_69 = arith.constant 0 : index
    %c0_70 = arith.constant 0 : index
    %230 = vector.load %arg1[%c7, %c0_69, %c0_70] : memref<8x8x512xf32, #tpu.memory_space<vmem>>, vector<1x8x512xf32>
    %231 = vector.shape_cast %230 : vector<1x8x512xf32> to vector<8x512xf32>
    %cst_71 = arith.constant dense<0.000000e+00> : vector<8x512xf32>
    %232 = tpu.matmul %226, %3, %cst_71 {dimension_numbers = #tpu.dot_dimension_numbers<[1], [0], [0], [1], [0, 0, 1, 1], [], []>} : vector<8x128xf32>, vector<128x512xf32>, vector<8x512xf32> -> vector<8x512xf32>
    %233 = arith.addf %231, %232 : vector<8x512xf32>
    %234 = vector.extract_strided_slice %233 {offsets = [0, 0], sizes = [8, 128], strides = [1, 1]} : vector<8x512xf32> to vector<8x128xf32>
    %235 = arith.negf %234 : vector<8x128xf32>
    %236 = math.exp %235 : vector<8x128xf32>
    %cst_72 = arith.constant 1.000000e+00 : f32
    %237 = vector.broadcast %cst_72 : f32 to vector<8x128xf32>
    %238 = arith.addf %237, %236 : vector<8x128xf32>
    %239 = arith.divf %237, %238 : vector<8x128xf32>
    %240 = vector.extract_strided_slice %233 {offsets = [0, 128], sizes = [8, 128], strides = [1, 1]} : vector<8x512xf32> to vector<8x128xf32>
    %241 = arith.negf %240 : vector<8x128xf32>
    %242 = math.exp %241 : vector<8x128xf32>
    %cst_73 = arith.constant 1.000000e+00 : f32
    %243 = vector.broadcast %cst_73 : f32 to vector<8x128xf32>
    %244 = arith.addf %243, %242 : vector<8x128xf32>
    %245 = arith.divf %243, %244 : vector<8x128xf32>
    %246 = vector.extract_strided_slice %233 {offsets = [0, 256], sizes = [8, 128], strides = [1, 1]} : vector<8x512xf32> to vector<8x128xf32>
    %247 = math.tanh %246 : vector<8x128xf32>
    %248 = vector.extract_strided_slice %233 {offsets = [0, 384], sizes = [8, 128], strides = [1, 1]} : vector<8x512xf32> to vector<8x128xf32>
    %249 = arith.negf %248 : vector<8x128xf32>
    %250 = math.exp %249 : vector<8x128xf32>
    %cst_74 = arith.constant 1.000000e+00 : f32
    %251 = vector.broadcast %cst_74 : f32 to vector<8x128xf32>
    %252 = arith.addf %251, %250 : vector<8x128xf32>
    %253 = arith.divf %251, %252 : vector<8x128xf32>
    %254 = arith.mulf %245, %224 : vector<8x128xf32>
    %255 = arith.mulf %239, %247 : vector<8x128xf32>
    %256 = arith.addf %254, %255 : vector<8x128xf32>
    %257 = math.tanh %256 : vector<8x128xf32>
    %258 = arith.mulf %253, %257 : vector<8x128xf32>
    %c7_75 = arith.constant 7 : index
    %c0_76 = arith.constant 0 : index
    %c0_77 = arith.constant 0 : index
    %259 = vector.load %arg3[%c7_75, %c0_76, %c0_77] : memref<8x8x128xf32, #tpu.memory_space<vmem>>, vector<1x8x128xf32>
    %260 = vector.shape_cast %259 : vector<1x8x128xf32> to vector<8x128xf32>
    %261 = vector.shape_cast %258 : vector<8x128xf32> to vector<1x8x128xf32>
    tpu.vector_store %arg3[%c7_75, %c0_76, %c0_77], %261 {strides = array<i32>} : memref<8x8x128xf32, #tpu.memory_space<vmem>>, vector<1x8x128xf32>,
    %c0_78 = arith.constant 0 : index
    %c0_79 = arith.constant 0 : index
    %262 = vector.load %arg6[%c0_78, %c0_79] : memref<8x128xf32, #tpu.memory_space<vmem>>, vector<8x128xf32>
    tpu.vector_store %arg6[%c0_78, %c0_79], %258 {strides = array<i32>} : memref<8x128xf32, #tpu.memory_space<vmem>>, vector<8x128xf32>,
    %c0_80 = arith.constant 0 : index
    %c0_81 = arith.constant 0 : index
    %263 = vector.load %arg7[%c0_80, %c0_81] : memref<8x128xf32, #tpu.memory_space<vmem>>, vector<8x128xf32>
    tpu.vector_store %arg7[%c0_80, %c0_81], %256 {strides = array<i32>} : memref<8x128xf32, #tpu.memory_space<vmem>>, vector<8x128xf32>,
    %c0_i32_82 = arith.constant 0 : i32
    %264 = arith.cmpi eq, %arg0, %c0_i32_82 : i32
    %265 = arith.extui %264 : i1 to i32
    %c0_i32_83 = arith.constant 0 : i32
    %266 = arith.cmpi ne, %265, %c0_i32_83 : i32
    scf.if %266 {
      %c0_84 = arith.constant 0 : index
      %c0_85 = arith.constant 0 : index
      %267 = vector.load %arg4[%c0_84, %c0_85] : memref<8x128xf32, #tpu.memory_space<vmem>>, vector<8x128xf32>
      tpu.vector_store %arg4[%c0_84, %c0_85], %258 {strides = array<i32>} : memref<8x128xf32, #tpu.memory_space<vmem>>, vector<8x128xf32>,
      %c0_86 = arith.constant 0 : index
      %c0_87 = arith.constant 0 : index
      %268 = vector.load %arg5[%c0_86, %c0_87] : memref<8x128xf32, #tpu.memory_space<vmem>>, vector<8x128xf32>
      tpu.vector_store %arg5[%c0_86, %c0_87], %256 {strides = array<i32>} : memref<8x128xf32, #tpu.memory_space<vmem>>, vector<8x128xf32>,
    } else {
    }
    return
  }
  func.func @transform_0(%arg0: i32) -> (i32, i32, i32) {
    %c0_i32 = arith.constant 0 : i32
    %c0_i32_0 = arith.constant 0 : i32
    %c0_i32_1 = arith.constant 0 : i32
    return %arg0, %c0_i32, %c0_i32_0 : i32, i32, i32
  }
  func.func @transform_1(%arg0: i32) -> (i32, i32) {
    %c0_i32 = arith.constant 0 : i32
    %c0_i32_0 = arith.constant 0 : i32
    %c0_i32_1 = arith.constant 0 : i32
    return %c0_i32, %c0_i32_0 : i32, i32
  }
  func.func @transform_2(%arg0: i32) -> (i32, i32, i32) {
    %c0_i32 = arith.constant 0 : i32
    %c0_i32_0 = arith.constant 0 : i32
    %c0_i32_1 = arith.constant 0 : i32
    return %arg0, %c0_i32, %c0_i32_0 : i32, i32, i32
  }
  func.func @transform_3(%arg0: i32) -> (i32, i32) {
    %c0_i32 = arith.constant 0 : i32
    %c0_i32_0 = arith.constant 0 : i32
    %c0_i32_1 = arith.constant 0 : i32
    return %c0_i32, %c0_i32_0 : i32, i32
  }
  func.func @transform_4(%arg0: i32) -> (i32, i32) {
    %c0_i32 = arith.constant 0 : i32
    %c0_i32_0 = arith.constant 0 : i32
    %c0_i32_1 = arith.constant 0 : i32
    return %c0_i32, %c0_i32_0 : i32, i32
  }
}

</mosaic_0001>

<bundles_post_ra>
// kernel: lstm_forward.2
= control target key start
LH: loop header
LB: loop body
LE: loop exit
PB: predicated region body
PF: predicated region fallthrough
CT: control target
= control target key end

     0   :  { %v2219_v3 = vmov 0.0   ;;  %s2925_s1 = inlined_call_operand.vmem [shape: f32[128,512], index: 1, kind: input, shape index: {}]   ;;  %s2926_s0 = inlined_call_operand.vmem [shape: f32[8,8,512], index: 0, kind: input, shape index: {}]   ;;  %s2927_s2 = inlined_call_operand.vmem [shape: f32[8,8,128], index: 2, kind: output, shape index: {0}]   ;;  %s2928_s4 = inlined_call_operand.vmem [shape: f32[8,128], index: 4, kind: output, shape index: {2}]   ;;  %s2929_s3 = inlined_call_operand.vmem [shape: f32[8,128], index: 3, kind: output, shape index: {1}]  }
   0x1   :  { %v21_v0 = vld [vmem:[%s2925_s1 + $0x8] sm:$0xff]  ;;  %v20_v2 = vld [vmem:[%s2925_s1] sm:$0xff]  ;;  %154 = vmatprep.mubr.f32.mxu0 %v2219_v3  ;;  %225 = vmatprep.mubr.f32.mxu1 %v2219_v3  ;;  %v23_v19 = vld [vmem:[%s2925_s1 + $0x18] sm:$0xff] }
   0x2   :  { %v25_v1 = vld [vmem:[%s2925_s1 + $0x28] sm:$0xff]  ;;  %v24_v5 = vld [vmem:[%s2925_s1 + $0x20] sm:$0xff]  ;;  %v27_v20 = vld [vmem:[%s2925_s1 + $0x38] sm:$0xff] }
   0x3   :  { %v2256_v4 = vpack.c.bf16 %v25_v1, %v21_v0  ;;  %v29_v6 = vld [vmem:[%s2925_s1 + $0x48] sm:$0xff]  ;;  %v2267_v8 = vpack.c.bf16 %v24_v5, %v20_v2  ;;  %v28_v10 = vld [vmem:[%s2925_s1 + $0x40] sm:$0xff]  ;;  %v2308_v22 = vpack.c.bf16 %v27_v20, %v23_v19  ;;  %v22_v23 = vld [vmem:[%s2925_s1 + $0x10] sm:$0xff] }
   0x4   :  { %v33_v7 = vld [vmem:[%s2925_s1 + $0x68] sm:$0xff]  ;;  %v32_v11 = vld [vmem:[%s2925_s1 + $0x60] sm:$0xff]  ;;  %v26_v24 = vld [vmem:[%s2925_s1 + $0x30] sm:$0xff] }
   0x5   :  { %v2269_v9 = vpack.c.bf16 %v33_v7, %v29_v6  ;;  %v37_v12 = vld [vmem:[%s2925_s1 + $0x88] sm:$0xff]  ;;  %1579 = vmatprep.subr.bf16.mxu0 %v2256_v4  ;;  %v2285_v14 = vpack.c.bf16 %v32_v11, %v28_v10  ;;  %v36_v15 = vld [vmem:[%s2925_s1 + $0x80] sm:$0xff]  ;;  %v2316_v25 = vpack.c.bf16 %v26_v24, %v22_v23  ;;  %1611 = vmatprep.subr.bf16.mxu1 %v2308_v22  ;;  %v31_v27 = vld [vmem:[%s2925_s1 + $0x58] sm:$0xff] }
   0x6   :  { %v41_v13 = vld [vmem:[%s2925_s1 + $0xa8] sm:$0xff]  ;;  %1581 = vmatpush1.bf16.msra.mxu0 %v2267_v8  ;;  %v40_v16 = vld [vmem:[%s2925_s1 + $0xa0] sm:$0xff]  ;;  %v35_v28 = vld [vmem:[%s2925_s1 + $0x78] sm:$0xff] }
   0x7   :  { %1583 = vmatprep.subr.bf16.mxu0 %v2269_v9  ;;  %v2294_v17 = vpack.c.bf16 %v41_v13, %v37_v12  ;;  %v45_v18 = vld [vmem:[%s2925_s1 + $0xc8] sm:$0xff]  ;;  %v2319_v26 = vpack.c.bf16 %v40_v16, %v36_v15  ;;  %v30_v29 = vld [vmem:[%s2925_s1 + $0x50] sm:$0xff]  ;;  %v44_v31 = vld [vmem:[%s2925_s1 + $0xc0] sm:$0xff]  ;;  %1613 = vmatpush1.bf16.msra.mxu1 %v2316_v25  ;;  %v2341_v33 = vpack.c.bf16 %v35_v28, %v31_v27 }
   0x8   :  { %v49_v21 = vld [vmem:[%s2925_s1 + $0xe8] sm:$0xff]  ;;  %v48_v32 = vld [vmem:[%s2925_s1 + $0xe0] sm:$0xff]  ;;  %v34_v34 = vld [vmem:[%s2925_s1 + $0x70] sm:$0xff] }
   0x9   :  { %v2332_v30 = vpack.c.bf16 %v49_v21, %v45_v18  ;;  %v53_v35 = vld [vmem:[%s2925_s1 + $0x108] sm:$0xff]  ;;  %v2352_v37 = vpack.c.bf16 %v34_v34, %v30_v29  ;;  %v39_v38 = vld [vmem:[%s2925_s1 + $0x98] sm:$0xff]  ;;  %1615 = vmatprep.subr.bf16.mxu1 %v2341_v33  ;;  %v38_v40 = vld [vmem:[%s2925_s1 + $0x90] sm:$0xff]  ;;  %v2368_v42 = vpack.c.bf16 %v48_v32, %v44_v31 }
   0xa   :  { %1585 = vmatpush1.bf16.msra.mxu0 %v2285_v14  ;;  %v57_v36 = vld [vmem:[%s2925_s1 + $0x128] sm:$0xff]  ;;  %v43_v39 = vld [vmem:[%s2925_s1 + $0xb8] sm:$0xff]  ;;  %v42_v41 = vld [vmem:[%s2925_s1 + $0xb0] sm:$0xff] }
   0xb   :  { %1587 = vmatprep.subr.bf16.mxu0 %v2294_v17  ;;  %v52_v43 = vld [vmem:[%s2925_s1 + $0x100] sm:$0xff]  ;;  %v2376_v45 = vpack.c.bf16 %v43_v39, %v39_v38  ;;  %v2379_v46 = vpack.c.bf16 %v57_v36, %v53_v35  ;;  %1617 = vmatpush1.bf16.msra.mxu1 %v2352_v37  ;;  %v61_v47 = vld [vmem:[%s2925_s1 + $0x148] sm:$0xff]  ;;  %v2385_v48 = vpack.c.bf16 %v42_v41, %v38_v40  ;;  %v47_v49 = vld [vmem:[%s2925_s1 + $0xd8] sm:$0xff] }
   0xc   :  { %v56_v44 = vld [vmem:[%s2925_s1 + $0x120] sm:$0xff]  ;;  %v51_v50 = vld [vmem:[%s2925_s1 + $0xf8] sm:$0xff]  ;;  %v65_v51 = vld [vmem:[%s2925_s1 + $0x168] sm:$0xff] }
   0xd   :  { %1619 = vmatprep.subr.bf16.mxu1 %v2376_v45  ;;  %v2397_v52 = vpack.c.bf16 %v51_v50, %v47_v49  ;;  %v46_v53 = vld [vmem:[%s2925_s1 + $0xd0] sm:$0xff]  ;;  %v2406_v55 = vpack.c.bf16 %v56_v44, %v52_v43  ;;  %v55_v56 = vld [vmem:[%s2925_s1 + $0x118] sm:$0xff]  ;;  %v2415_v58 = vpack.c.bf16 %v65_v51, %v61_v47  ;;  %v60_v59 = vld [vmem:[%s2925_s1 + $0x140] sm:$0xff] }
   0xe   :  { %1589 = vmatpush1.bf16.msra.mxu0 %v2319_v26  ;;  %v50_v54 = vld [vmem:[%s2925_s1 + $0xf0] sm:$0xff]  ;;  %v59_v57 = vld [vmem:[%s2925_s1 + $0x138] sm:$0xff]  ;;  %v64_v60 = vld [vmem:[%s2925_s1 + $0x160] sm:$0xff] }
   0xf   :  { %1591 = vmatprep.subr.bf16.mxu0 %v2332_v30  ;;  %1621 = vmatpush1.bf16.msra.mxu1 %v2385_v48  ;;  %v69_v61 = vld [vmem:[%s2925_s1 + $0x188] sm:$0xff]  ;;  %v2427_v62 = vpack.c.bf16 %v50_v54, %v46_v53  ;;  %v2433_v0 = vpack.c.bf16 %v59_v57, %v55_v56  ;;  %v54_v1 = vld [vmem:[%s2925_s1 + $0x110] sm:$0xff]  ;;  %v63_v5 = vld [vmem:[%s2925_s1 + $0x158] sm:$0xff]  ;;  %v2448_v7 = vpack.c.bf16 %v64_v60, %v60_v59 }
  0x10   :  { %v73_v63 = vld [vmem:[%s2925_s1 + $0x1a8] sm:$0xff]  ;;  %1623 = vmatprep.subr.bf16.mxu1 %v2397_v52  ;;  %v58_v2 = vld [vmem:[%s2925_s1 + $0x130] sm:$0xff]  ;;  %v67_v6 = vld [vmem:[%s2925_s1 + $0x178] sm:$0xff] }
  0x11   :  { %v2451_v10 = vpack.c.bf16 %v73_v63, %v69_v61  ;;  %v68_v11 = vld [vmem:[%s2925_s1 + $0x180] sm:$0xff]  ;;  %v77_v13 = vld [vmem:[%s2925_s1 + $0x1c8] sm:$0xff]  ;;  %v2463_v15 = vpack.c.bf16 %v58_v2, %v54_v1  ;;  %v2469_v18 = vpack.c.bf16 %v67_v6, %v63_v5  ;;  %v62_v19 = vld [vmem:[%s2925_s1 + $0x150] sm:$0xff] }
  0x12   :  { %1593 = vmatpush1.bf16.msra.mxu0 %v2368_v42  ;;  %v72_v12 = vld [vmem:[%s2925_s1 + $0x1a0] sm:$0xff]  ;;  %v81_v16 = vld [vmem:[%s2925_s1 + $0x1e8] sm:$0xff]  ;;  %v66_v20 = vld [vmem:[%s2925_s1 + $0x170] sm:$0xff] }
  0x13   :  { %1595 = vmatprep.subr.bf16.mxu0 %v2379_v46  ;;  %1625 = vmatpush1.bf16.msra.mxu1 %v2427_v62  ;;  %v71_v21 = vld [vmem:[%s2925_s1 + $0x198] sm:$0xff]  ;;  %v2484_v24 = vpack.c.bf16 %v72_v12, %v68_v11  ;;  %v2487_v27 = vpack.c.bf16 %v81_v16, %v77_v13  ;;  %v76_v28 = vld [vmem:[%s2925_s1 + $0x1c0] sm:$0xff]  ;;  %v2496_v31 = vpack.c.bf16 %v66_v20, %v62_v19  ;;  %v70_v34 = vld [vmem:[%s2925_s1 + $0x190] sm:$0xff] }
  0x14   :  { %1627 = vmatprep.subr.bf16.mxu1 %v2433_v0  ;;  %v75_v23 = vld [vmem:[%s2925_s1 + $0x1b8] sm:$0xff]  ;;  %v80_v29 = vld [vmem:[%s2925_s1 + $0x1e0] sm:$0xff]  ;;  %v74_v35 = vld [vmem:[%s2925_s1 + $0x1b0] sm:$0xff] }
  0x15   :  { %v2499_v32 = vpack.c.bf16 %v75_v23, %v71_v21  ;;  %v79_v36 = vld [vmem:[%s2925_s1 + $0x1d8] sm:$0xff]  ;;  %v2514_v39 = vpack.c.bf16 %v80_v29, %v76_v28  ;;  %v2518_v40 = vpack.c.bf16 %v74_v35, %v70_v34  ;;  %v78_v43 = vld [vmem:[%s2925_s1 + $0x1d0] sm:$0xff]  ;;  %v86_v49 = vld [vmem:[%s2926_s0] sm:$0xff] }
  0x16   :  { %1597 = vmatpush1.bf16.msra.mxu0 %v2406_v55  ;;  %v83_v38 = vld [vmem:[%s2925_s1 + $0x1f8] sm:$0xff]  ;;  %v82_v44 = vld [vmem:[%s2925_s1 + $0x1f0] sm:$0xff]  ;;  %v87_v50 = vld [vmem:[%s2926_s0 + $0x8] sm:$0xff] }
  0x17   :  { %1599 = vmatprep.subr.bf16.mxu0 %v2415_v58  ;;  %1629 = vmatpush1.bf16.msra.mxu1 %v2463_v15  ;;  %v2521_v41 = vpack.c.bf16 %v83_v38, %v79_v36  ;;  %v2531_v47 = vpack.c.bf16 %v82_v44, %v78_v43  ;;  %v89_v60 = vld [vmem:[%s2926_s0 + $0x18] sm:$0xff]  ;;  %v88_v2 = vld [vmem:[%s2926_s0 + $0x10] sm:$0xff]  ;;  %v1522_v44 = vld [vmem:[%s2926_s0 + $0x20] sm:$0xff] }
  0x18   :  { %1631 = vmatprep.subr.bf16.mxu1 %v2469_v18 }
  0x1a   :  { %1601 = vmatpush1.bf16.msra.mxu0 %v2448_v7 }
  0x1b   :  { %1603 = vmatprep.subr.bf16.mxu0 %v2451_v10  ;;  %1633 = vmatpush1.bf16.msra.mxu1 %v2496_v31 }
  0x1c   :  { %1635 = vmatprep.subr.bf16.mxu1 %v2499_v32 }
  0x1e   :  { %1605 = vmatpush1.bf16.msra.mxu0 %v2484_v24 }
  0x1f   :  { %1607 = vmatprep.subr.bf16.mxu0 %v2487_v27  ;;  %1637 = vmatpush1.bf16.msra.mxu1 %v2518_v40 }
  0x20   :  { %1639 = vmatprep.subr.bf16.mxu1 %v2521_v41 }
  0x22   :  { %1609 = vmatpush1.bf16.msra.mxu0 %v2514_v39 }
  0x23   :  { %1643 = vmatprep.subr.bf16.mxu0 %v2256_v4  ;;  %1641 = vmatpush1.bf16.msra.mxu1 %v2531_v47 }
  0x24   :  { %1675 = vmatprep.subr.bf16.mxu1 %v2308_v22 }
  0x25   :  { %155 = vmatmul.mubr.f32.vlgmr.msra.gmra.mrb[0].mxu0 %v2219_v3 }
  0x26   :  { %1645 = vmatpush1.bf16.msra.mxu0 %v2267_v8  ;;  %330 = vmatprep.mubr.f32.mxu0 %v2219_v3 }
  0x27   :  { %1647 = vmatprep.subr.bf16.mxu0 %v2269_v9  ;;  %226 = vmatmul.mubr.f32.vlgmr.msra.gmra.mrb[0].mxu1 %v2219_v3 }
  0x28   :  { %1677 = vmatpush1.bf16.msra.mxu1 %v2316_v25  ;;  %401 = vmatprep.mubr.f32.mxu1 %v2219_v3 }
  0x29   :  { %1679 = vmatprep.subr.bf16.mxu1 %v2341_v33 }
  0x2a   :  { %1649 = vmatpush1.bf16.msra.mxu0 %v2285_v14 }
  0x2b   :  { %1651 = vmatprep.subr.bf16.mxu0 %v2294_v17 }
  0x2c   :  { %1681 = vmatpush1.bf16.msra.mxu1 %v2352_v37 }
  0x2d   :  { %1683 = vmatprep.subr.bf16.mxu1 %v2376_v45 }
  0x2e   :  { %1653 = vmatpush1.bf16.msra.mxu0 %v2319_v26 }
  0x2f   :  { %1655 = vmatprep.subr.bf16.mxu0 %v2332_v30 }
  0x30   :  { %1685 = vmatpush1.bf16.msra.mxu1 %v2385_v48 }
  0x31   :  { %1687 = vmatprep.subr.bf16.mxu1 %v2397_v52 }
  0x32   :  { %1657 = vmatpush1.bf16.msra.mxu0 %v2368_v42 }
  0x33   :  { %1659 = vmatprep.subr.bf16.mxu0 %v2379_v46 }
  0x34   :  { %1689 = vmatpush1.bf16.msra.mxu1 %v2427_v62 }
  0x35   :  { %1691 = vmatprep.subr.bf16.mxu1 %v2433_v0 }
  0x36   :  { %1661 = vmatpush1.bf16.msra.mxu0 %v2406_v55 }
  0x37   :  { %1663 = vmatprep.subr.bf16.mxu0 %v2415_v58 }
  0x38   :  { %1693 = vmatpush1.bf16.msra.mxu1 %v2463_v15 }
  0x39   :  { %1695 = vmatprep.subr.bf16.mxu1 %v2469_v18 }
  0x3a   :  { %1665 = vmatpush1.bf16.msra.mxu0 %v2448_v7 }
  0x3b   :  { %1667 = vmatprep.subr.bf16.mxu0 %v2451_v10 }
  0x3c   :  { %1697 = vmatpush1.bf16.msra.mxu1 %v2496_v31 }
  0x3d   :  { %1699 = vmatprep.subr.bf16.mxu1 %v2499_v32 }
  0x3e   :  { %1669 = vmatpush1.bf16.msra.mxu0 %v2484_v24 }
  0x3f   :  { %1671 = vmatprep.subr.bf16.mxu0 %v2487_v27 }
  0x40   :  { %1701 = vmatpush1.bf16.msra.mxu1 %v2518_v40 }
  0x41   :  { %1703 = vmatprep.subr.bf16.mxu1 %v2521_v41 }
  0x42   :  { %1673 = vmatpush1.bf16.msra.mxu0 %v2514_v39 }
  0x43   :  { %1707 = vmatprep.subr.bf16.mxu0 %v2256_v4 }
  0x44   :  { %1705 = vmatpush1.bf16.msra.mxu1 %v2531_v47 }
  0x45   :  { %1739 = vmatprep.subr.bf16.mxu1 %v2308_v22 }
  0xf8   :  { %v156_v51 = vpop.f32.mrb[0].mxu0 }
  0xf9   :  { %v232_v53 = vadd.f32 %v156_v51, %v86_v49  ;;  %v158_v54 = vpop.f32.mrb[1].mxu0  ;;  %v1523_v49 = vld [vmem:[%s2926_s0 + $0x28] sm:$0xff] }
  0xfa   :  { %v233_v56 = vadd.f32 %v158_v54, %v87_v50  ;;  %v227_v61 = vpop.f32.mrb[0].mxu1 }
  0xfb   :  { %v1519_v57 = vmul.f32 -1.442695, %v232_v53  ;;  %v229_v63 = vpop.f32.mrb[1].mxu1  ;;  %v234_v6 = vadd.f32 %v227_v61, %v88_v2  ;;  %v1525_v61 = vld [vmem:[%s2926_s0 + $0x38] sm:$0xff] }
  0xfc   :  { %v1520_v59 = vmul.f32 -1.442695, %v233_v56  ;;  %v235_v1 = vadd.f32 %v229_v63, %v89_v60 }
  0xfd   :  { %2091 = vpow2.f32 %v1519_v57 }
  0xfe   :  { %2093 = vpow2.f32 %v1520_v59  ;;  %v1521_v5 = vmul.f32 -1.442695, %v235_v1  ;;  %v1524_v1 = vld [vmem:[%s2926_s0 + $0x30] sm:$0xff] }
 0x100   :  { %2095 = vpow2.f32 %v1521_v5 }
 0x101   :  { %2097 = vtanh.f32 %v234_v6 }
 0x107   :  { %v2092_v11 = vpop.eup %2091 }
 0x108   :  { %v2094_v12 = vpop.eup %2093  ;;  %v239_v13 = vadd.f32 1.0, %v2092_v11 }
 0x109   :  { %v245_v16 = vadd.f32 1.0, %v2094_v12 }
 0x10a   :  { %2099 = vrcp.f32 %v239_v13  ;;  %v2096_v19 = vpop.eup %2095 }
 0x10b   :  { %2101 = vrcp.f32 %v245_v16  ;;  %v2098_v20 = vpop.eup %2097  ;;  %v252_v23 = vadd.f32 1.0, %v2096_v19 }
 0x10d   :  { %2103 = vrcp.f32 %v252_v23 }
 0x114   :  { %v2100_v21 = vpop.eup %2099 }
 0x115   :  { %v2102_v28 = vpop.eup %2101  ;;  %v256_v29 = vmul.f32 %v2100_v21, %v2098_v20 }
 0x116   :  { %v255_v34 = vmul.f32 0.0, %v2102_v28 }
 0x117   :  { %v2104_v36 = vpop.eup %2103 }
 0x118   :  { %v2585_v35 = vadd.f32 %v256_v29, %v255_v34 }
 0x11a   :  { %2105 = vtanh.f32 %v2585_v35 }
 0x124   :  { %v2106_v38 = vpop.eup %2105 }
 0x125   :  { %v259_v43 = vmul.f32 %v2106_v38, %v2104_v36 }
 0x127   :  { %260 = vst [vmem:[%s2927_s2] sm:$0xff] %v259_v43  ;;  %331 = vmatmul.mubr.f32.vlgmr.msra.gmra.mrb[2].mxu0 %v259_v43  ;;  %402 = vmatmul.mubr.f32.vlgmr.msra.gmra.mrb[2].mxu1 %v259_v43 }
 0x128   :  { %1709 = vmatpush1.bf16.msra.mxu0 %v2267_v8  ;;  %1741 = vmatpush1.bf16.msra.mxu1 %v2316_v25 }
 0x129   :  { %1711 = vmatprep.subr.bf16.mxu0 %v2269_v9  ;;  %1743 = vmatprep.subr.bf16.mxu1 %v2341_v33 }
 0x12a   :  { %507 = vmatprep.mubr.f32.mxu0 %v2219_v3  ;;  %578 = vmatprep.mubr.f32.mxu1 %v2219_v3 }
 0x12c   :  { %1713 = vmatpush1.bf16.msra.mxu0 %v2285_v14  ;;  %1745 = vmatpush1.bf16.msra.mxu1 %v2352_v37 }
 0x12d   :  { %1715 = vmatprep.subr.bf16.mxu0 %v2294_v17  ;;  %1747 = vmatprep.subr.bf16.mxu1 %v2376_v45 }
 0x130   :  { %1717 = vmatpush1.bf16.msra.mxu0 %v2319_v26  ;;  %1749 = vmatpush1.bf16.msra.mxu1 %v2385_v48 }
 0x131   :  { %1719 = vmatprep.subr.bf16.mxu0 %v2332_v30  ;;  %1751 = vmatprep.subr.bf16.mxu1 %v2397_v52 }
 0x134   :  { %1721 = vmatpush1.bf16.msra.mxu0 %v2368_v42  ;;  %1753 = vmatpush1.bf16.msra.mxu1 %v2427_v62 }
 0x135   :  { %1723 = vmatprep.subr.bf16.mxu0 %v2379_v46  ;;  %1755 = vmatprep.subr.bf16.mxu1 %v2433_v0 }
 0x138   :  { %1725 = vmatpush1.bf16.msra.mxu0 %v2406_v55  ;;  %1757 = vmatpush1.bf16.msra.mxu1 %v2463_v15 }
 0x139   :  { %1727 = vmatprep.subr.bf16.mxu0 %v2415_v58  ;;  %1759 = vmatprep.subr.bf16.mxu1 %v2469_v18 }
 0x13c   :  { %1729 = vmatpush1.bf16.msra.mxu0 %v2448_v7  ;;  %1761 = vmatpush1.bf16.msra.mxu1 %v2496_v31 }
 0x13d   :  { %1731 = vmatprep.subr.bf16.mxu0 %v2451_v10  ;;  %1763 = vmatprep.subr.bf16.mxu1 %v2499_v32 }
 0x140   :  { %1733 = vmatpush1.bf16.msra.mxu0 %v2484_v24  ;;  %1765 = vmatpush1.bf16.msra.mxu1 %v2518_v40 }
 0x141   :  { %1735 = vmatprep.subr.bf16.mxu0 %v2487_v27  ;;  %1767 = vmatprep.subr.bf16.mxu1 %v2521_v41 }
 0x144   :  { %1737 = vmatpush1.bf16.msra.mxu0 %v2514_v39  ;;  %1769 = vmatpush1.bf16.msra.mxu1 %v2531_v47 }
 0x145   :  { %1771 = vmatprep.subr.bf16.mxu0 %v2256_v4  ;;  %1803 = vmatprep.subr.bf16.mxu1 %v2308_v22 }
 0x1fa   :  { %v332_v50 = vpop.f32.mrb[2].mxu0  ;;  %v403_v51 = vpop.f32.mrb[2].mxu1 }
 0x1fb   :  { %v408_v53 = vadd.f32 %v1522_v44, %v332_v50  ;;  %v334_v54 = vpop.f32.mrb[3].mxu0  ;;  %v405_v56 = vpop.f32.mrb[3].mxu1  ;;  %v410_v5 = vadd.f32 %v1524_v1, %v403_v51  ;;  %v1531_v44 = vld [vmem:[%s2926_s0 + $0x48] sm:$0xff] }
 0x1fc   :  { %v409_v57 = vadd.f32 %v1523_v49, %v334_v54  ;;  %v411_v63 = vadd.f32 %v1525_v61, %v405_v56 }
 0x1fd   :  { %v1526_v59 = vmul.f32 -1.442695, %v408_v53 }
 0x1fe   :  { %v1527_v60 = vmul.f32 -1.442695, %v409_v57  ;;  %v1528_v2 = vmul.f32 -1.442695, %v411_v63  ;;  %v1532_v63 = vld [vmem:[%s2926_s0 + $0x50] sm:$0xff] }
 0x1ff   :  { %2107 = vpow2.f32 %v1526_v59 }
 0x200   :  { %2109 = vpow2.f32 %v1527_v60  ;;  %v1533_v60 = vld [vmem:[%s2926_s0 + $0x58] sm:$0xff] }
 0x201   :  { %2111 = vpow2.f32 %v1528_v2 }
 0x202   :  { %2113 = vtanh.f32 %v410_v5 }
 0x209   :  { %v2108_v6 = vpop.eup %2107 }
 0x20a   :  { %v2110_v11 = vpop.eup %2109  ;;  %v415_v12 = vadd.f32 1.0, %v2108_v6 }
 0x20b   :  { %v421_v13 = vadd.f32 1.0, %v2110_v11  ;;  %v2112_v16 = vpop.eup %2111 }
 0x20c   :  { %2115 = vrcp.f32 %v415_v12  ;;  %v2114_v19 = vpop.eup %2113  ;;  %v428_v28 = vadd.f32 1.0, %v2112_v16 }
 0x20d   :  { %2117 = vrcp.f32 %v421_v13 }
 0x20e   :  { %2119 = vrcp.f32 %v428_v28 }
 0x216   :  { %v2116_v20 = vpop.eup %2115 }
 0x217   :  { %v2118_v21 = vpop.eup %2117  ;;  %v432_v23 = vmul.f32 %v2116_v20, %v2114_v19 }
 0x218   :  { %v431_v29 = vmul.f32 %v2118_v21, %v2585_v35  ;;  %v2120_v36 = vpop.eup %2119  ;;  %v1530_v35 = vld [vmem:[%s2926_s0 + $0x40] sm:$0xff] }
 0x21a   :  { %v2638_v34 = vadd.f32 %v432_v23, %v431_v29 }
 0x21c   :  { %2121 = vtanh.f32 %v2638_v34 }
 0x226   :  { %v2122_v38 = vpop.eup %2121 }
 0x227   :  { %v435_v43 = vmul.f32 %v2122_v38, %v2120_v36 }
 0x229   :  { %1529 = vst [vmem:[%s2927_s2 + $0x8] sm:$0xff] %v435_v43  ;;  %508 = vmatmul.mubr.f32.vlgmr.msra.gmra.mrb[4].mxu0 %v435_v43  ;;  %579 = vmatmul.mubr.f32.vlgmr.msra.gmra.mrb[4].mxu1 %v435_v43 }
 0x22a   :  { %1773 = vmatpush1.bf16.msra.mxu0 %v2267_v8  ;;  %1805 = vmatpush1.bf16.msra.mxu1 %v2316_v25 }
 0x22b   :  { %1775 = vmatprep.subr.bf16.mxu0 %v2269_v9  ;;  %1807 = vmatprep.subr.bf16.mxu1 %v2341_v33 }
 0x22c   :  { %684 = vmatprep.mubr.f32.mxu0 %v2219_v3  ;;  %755 = vmatprep.mubr.f32.mxu1 %v2219_v3 }
 0x22e   :  { %1777 = vmatpush1.bf16.msra.mxu0 %v2285_v14  ;;  %1809 = vmatpush1.bf16.msra.mxu1 %v2352_v37 }
 0x22f   :  { %1779 = vmatprep.subr.bf16.mxu0 %v2294_v17  ;;  %1811 = vmatprep.subr.bf16.mxu1 %v2376_v45 }
 0x232   :  { %1781 = vmatpush1.bf16.msra.mxu0 %v2319_v26  ;;  %1813 = vmatpush1.bf16.msra.mxu1 %v2385_v48 }
 0x233   :  { %1783 = vmatprep.subr.bf16.mxu0 %v2332_v30  ;;  %1815 = vmatprep.subr.bf16.mxu1 %v2397_v52 }
 0x236   :  { %1785 = vmatpush1.bf16.msra.mxu0 %v2368_v42  ;;  %1817 = vmatpush1.bf16.msra.mxu1 %v2427_v62 }
 0x237   :  { %1787 = vmatprep.subr.bf16.mxu0 %v2379_v46  ;;  %1819 = vmatprep.subr.bf16.mxu1 %v2433_v0 }
 0x23a   :  { %1789 = vmatpush1.bf16.msra.mxu0 %v2406_v55  ;;  %1821 = vmatpush1.bf16.msra.mxu1 %v2463_v15 }
 0x23b   :  { %1791 = vmatprep.subr.bf16.mxu0 %v2415_v58  ;;  %1823 = vmatprep.subr.bf16.mxu1 %v2469_v18 }
 0x23e   :  { %1793 = vmatpush1.bf16.msra.mxu0 %v2448_v7  ;;  %1825 = vmatpush1.bf16.msra.mxu1 %v2496_v31 }
 0x23f   :  { %1795 = vmatprep.subr.bf16.mxu0 %v2451_v10  ;;  %1827 = vmatprep.subr.bf16.mxu1 %v2499_v32 }
 0x242   :  { %1797 = vmatpush1.bf16.msra.mxu0 %v2484_v24  ;;  %1829 = vmatpush1.bf16.msra.mxu1 %v2518_v40 }
 0x243   :  { %1799 = vmatprep.subr.bf16.mxu0 %v2487_v27  ;;  %1831 = vmatprep.subr.bf16.mxu1 %v2521_v41 }
 0x246   :  { %1801 = vmatpush1.bf16.msra.mxu0 %v2514_v39  ;;  %1833 = vmatpush1.bf16.msra.mxu1 %v2531_v47 }
 0x247   :  { %1835 = vmatprep.subr.bf16.mxu0 %v2256_v4  ;;  %1867 = vmatprep.subr.bf16.mxu1 %v2308_v22 }
 0x2fc   :  { %v509_v49 = vpop.f32.mrb[4].mxu0  ;;  %v580_v50 = vpop.f32.mrb[4].mxu1 }
 0x2fd   :  { %v585_v51 = vadd.f32 %v1530_v35, %v509_v49  ;;  %v511_v53 = vpop.f32.mrb[5].mxu0  ;;  %v582_v54 = vpop.f32.mrb[5].mxu1  ;;  %v587_v2 = vadd.f32 %v1532_v63, %v580_v50  ;;  %v1539_v35 = vld [vmem:[%s2926_s0 + $0x68] sm:$0xff] }
 0x2fe   :  { %v586_v56 = vadd.f32 %v1531_v44, %v511_v53  ;;  %v588_v61 = vadd.f32 %v1533_v60, %v582_v54 }
 0x2ff   :  { %v1534_v57 = vmul.f32 -1.442695, %v585_v51 }
 0x300   :  { %v1535_v59 = vmul.f32 -1.442695, %v586_v56  ;;  %v1536_v1 = vmul.f32 -1.442695, %v588_v61  ;;  %v1540_v61 = vld [vmem:[%s2926_s0 + $0x70] sm:$0xff] }
 0x301   :  { %2123 = vpow2.f32 %v1534_v57 }
 0x302   :  { %2125 = vpow2.f32 %v1535_v59  ;;  %v1541_v59 = vld [vmem:[%s2926_s0 + $0x78] sm:$0xff] }
 0x303   :  { %2127 = vpow2.f32 %v1536_v1 }
 0x304   :  { %2129 = vtanh.f32 %v587_v2 }
 0x30b   :  { %v2124_v5 = vpop.eup %2123 }
 0x30c   :  { %v2126_v6 = vpop.eup %2125  ;;  %v592_v11 = vadd.f32 1.0, %v2124_v5 }
 0x30d   :  { %v598_v12 = vadd.f32 1.0, %v2126_v6  ;;  %v2128_v13 = vpop.eup %2127 }
 0x30e   :  { %2131 = vrcp.f32 %v592_v11  ;;  %v2130_v16 = vpop.eup %2129  ;;  %v605_v23 = vadd.f32 1.0, %v2128_v13 }
 0x30f   :  { %2133 = vrcp.f32 %v598_v12 }
 0x310   :  { %2135 = vrcp.f32 %v605_v23 }
 0x318   :  { %v2132_v19 = vpop.eup %2131 }
 0x319   :  { %v2134_v20 = vpop.eup %2133  ;;  %v609_v21 = vmul.f32 %v2132_v19, %v2130_v16 }
 0x31a   :  { %v608_v28 = vmul.f32 %v2134_v20, %v2638_v34  ;;  %v2136_v36 = vpop.eup %2135  ;;  %v1538_v34 = vld [vmem:[%s2926_s0 + $0x60] sm:$0xff] }
 0x31c   :  { %v2691_v29 = vadd.f32 %v609_v21, %v608_v28 }
 0x31e   :  { %2137 = vtanh.f32 %v2691_v29 }
 0x328   :  { %v2138_v38 = vpop.eup %2137 }
 0x329   :  { %v612_v43 = vmul.f32 %v2138_v38, %v2136_v36 }
 0x32b   :  { %1537 = vst [vmem:[%s2927_s2 + $0x10] sm:$0xff] %v612_v43  ;;  %685 = vmatmul.mubr.f32.vlgmr.msra.gmra.mrb[6].mxu0 %v612_v43  ;;  %756 = vmatmul.mubr.f32.vlgmr.msra.gmra.mrb[6].mxu1 %v612_v43 }
 0x32c   :  { %1837 = vmatpush1.bf16.msra.mxu0 %v2267_v8  ;;  %1869 = vmatpush1.bf16.msra.mxu1 %v2316_v25 }
 0x32d   :  { %1839 = vmatprep.subr.bf16.mxu0 %v2269_v9  ;;  %1871 = vmatprep.subr.bf16.mxu1 %v2341_v33 }
 0x32e   :  { %861 = vmatprep.mubr.f32.mxu0 %v2219_v3  ;;  %932 = vmatprep.mubr.f32.mxu1 %v2219_v3 }
 0x330   :  { %1841 = vmatpush1.bf16.msra.mxu0 %v2285_v14  ;;  %1873 = vmatpush1.bf16.msra.mxu1 %v2352_v37 }
 0x331   :  { %1843 = vmatprep.subr.bf16.mxu0 %v2294_v17  ;;  %1875 = vmatprep.subr.bf16.mxu1 %v2376_v45 }
 0x334   :  { %1845 = vmatpush1.bf16.msra.mxu0 %v2319_v26  ;;  %1877 = vmatpush1.bf16.msra.mxu1 %v2385_v48 }
 0x335   :  { %1847 = vmatprep.subr.bf16.mxu0 %v2332_v30  ;;  %1879 = vmatprep.subr.bf16.mxu1 %v2397_v52 }
 0x338   :  { %1849 = vmatpush1.bf16.msra.mxu0 %v2368_v42  ;;  %1881 = vmatpush1.bf16.msra.mxu1 %v2427_v62 }
 0x339   :  { %1851 = vmatprep.subr.bf16.mxu0 %v2379_v46  ;;  %1883 = vmatprep.subr.bf16.mxu1 %v2433_v0 }
 0x33c   :  { %1853 = vmatpush1.bf16.msra.mxu0 %v2406_v55  ;;  %1885 = vmatpush1.bf16.msra.mxu1 %v2463_v15 }
 0x33d   :  { %1855 = vmatprep.subr.bf16.mxu0 %v2415_v58  ;;  %1887 = vmatprep.subr.bf16.mxu1 %v2469_v18 }
 0x340   :  { %1857 = vmatpush1.bf16.msra.mxu0 %v2448_v7  ;;  %1889 = vmatpush1.bf16.msra.mxu1 %v2496_v31 }
 0x341   :  { %1859 = vmatprep.subr.bf16.mxu0 %v2451_v10  ;;  %1891 = vmatprep.subr.bf16.mxu1 %v2499_v32 }
 0x344   :  { %1861 = vmatpush1.bf16.msra.mxu0 %v2484_v24  ;;  %1893 = vmatpush1.bf16.msra.mxu1 %v2518_v40 }
 0x345   :  { %1863 = vmatprep.subr.bf16.mxu0 %v2487_v27  ;;  %1895 = vmatprep.subr.bf16.mxu1 %v2521_v41 }
 0x348   :  { %1865 = vmatpush1.bf16.msra.mxu0 %v2514_v39  ;;  %1897 = vmatpush1.bf16.msra.mxu1 %v2531_v47 }
 0x349   :  { %1899 = vmatprep.subr.bf16.mxu0 %v2256_v4  ;;  %1931 = vmatprep.subr.bf16.mxu1 %v2308_v22 }
 0x3fe   :  { %v686_v44 = vpop.f32.mrb[6].mxu0  ;;  %v757_v49 = vpop.f32.mrb[6].mxu1 }
 0x3ff   :  { %v762_v50 = vadd.f32 %v1538_v34, %v686_v44  ;;  %v688_v51 = vpop.f32.mrb[7].mxu0  ;;  %v759_v53 = vpop.f32.mrb[7].mxu1  ;;  %v764_v1 = vadd.f32 %v1540_v61, %v757_v49  ;;  %v1547_v34 = vld [vmem:[%s2926_s0 + $0x88] sm:$0xff] }
 0x400   :  { %v763_v54 = vadd.f32 %v1539_v35, %v688_v51  ;;  %v765_v60 = vadd.f32 %v1541_v59, %v759_v53 }
 0x401   :  { %v1542_v56 = vmul.f32 -1.442695, %v762_v50 }
 0x402   :  { %v1543_v57 = vmul.f32 -1.442695, %v763_v54  ;;  %v1544_v63 = vmul.f32 -1.442695, %v765_v60  ;;  %v1548_v60 = vld [vmem:[%s2926_s0 + $0x90] sm:$0xff] }
 0x403   :  { %2139 = vpow2.f32 %v1542_v56 }
 0x404   :  { %2141 = vpow2.f32 %v1543_v57  ;;  %v1549_v57 = vld [vmem:[%s2926_s0 + $0x98] sm:$0xff] }
 0x405   :  { %2143 = vpow2.f32 %v1544_v63 }
 0x406   :  { %2145 = vtanh.f32 %v764_v1 }
 0x40d   :  { %v2140_v2 = vpop.eup %2139 }
 0x40e   :  { %v2142_v5 = vpop.eup %2141  ;;  %v769_v6 = vadd.f32 1.0, %v2140_v2 }
 0x40f   :  { %v775_v11 = vadd.f32 1.0, %v2142_v5  ;;  %v2144_v12 = vpop.eup %2143 }
 0x410   :  { %2147 = vrcp.f32 %v769_v6  ;;  %v2146_v13 = vpop.eup %2145  ;;  %v782_v21 = vadd.f32 1.0, %v2144_v12 }
 0x411   :  { %2149 = vrcp.f32 %v775_v11 }
 0x412   :  { %2151 = vrcp.f32 %v782_v21 }
 0x41a   :  { %v2148_v16 = vpop.eup %2147 }
 0x41b   :  { %v2150_v19 = vpop.eup %2149  ;;  %v786_v20 = vmul.f32 %v2148_v16, %v2146_v13 }
 0x41c   :  { %v785_v23 = vmul.f32 %v2150_v19, %v2691_v29  ;;  %v2152_v36 = vpop.eup %2151  ;;  %v1546_v29 = vld [vmem:[%s2926_s0 + $0x80] sm:$0xff] }
 0x41e   :  { %v2744_v28 = vadd.f32 %v786_v20, %v785_v23 }
 0x420   :  { %2153 = vtanh.f32 %v2744_v28 }
 0x42a   :  { %v2154_v38 = vpop.eup %2153 }
 0x42b   :  { %v789_v43 = vmul.f32 %v2154_v38, %v2152_v36 }
 0x42d   :  { %1545 = vst [vmem:[%s2927_s2 + $0x18] sm:$0xff] %v789_v43  ;;  %862 = vmatmul.mubr.f32.vlgmr.msra.gmra.mrb[8].mxu0 %v789_v43  ;;  %933 = vmatmul.mubr.f32.vlgmr.msra.gmra.mrb[8].mxu1 %v789_v43 }
 0x42e   :  { %1901 = vmatpush1.bf16.msra.mxu0 %v2267_v8  ;;  %1933 = vmatpush1.bf16.msra.mxu1 %v2316_v25 }
 0x42f   :  { %1903 = vmatprep.subr.bf16.mxu0 %v2269_v9  ;;  %1935 = vmatprep.subr.bf16.mxu1 %v2341_v33 }
 0x430   :  { %1038 = vmatprep.mubr.f32.mxu0 %v2219_v3  ;;  %1109 = vmatprep.mubr.f32.mxu1 %v2219_v3 }
 0x432   :  { %1905 = vmatpush1.bf16.msra.mxu0 %v2285_v14  ;;  %1937 = vmatpush1.bf16.msra.mxu1 %v2352_v37 }
 0x433   :  { %1907 = vmatprep.subr.bf16.mxu0 %v2294_v17  ;;  %1939 = vmatprep.subr.bf16.mxu1 %v2376_v45 }
 0x436   :  { %1909 = vmatpush1.bf16.msra.mxu0 %v2319_v26  ;;  %1941 = vmatpush1.bf16.msra.mxu1 %v2385_v48 }
 0x437   :  { %1911 = vmatprep.subr.bf16.mxu0 %v2332_v30  ;;  %1943 = vmatprep.subr.bf16.mxu1 %v2397_v52 }
 0x43a   :  { %1913 = vmatpush1.bf16.msra.mxu0 %v2368_v42  ;;  %1945 = vmatpush1.bf16.msra.mxu1 %v2427_v62 }
 0x43b   :  { %1915 = vmatprep.subr.bf16.mxu0 %v2379_v46  ;;  %1947 = vmatprep.subr.bf16.mxu1 %v2433_v0 }
 0x43e   :  { %1917 = vmatpush1.bf16.msra.mxu0 %v2406_v55  ;;  %1949 = vmatpush1.bf16.msra.mxu1 %v2463_v15 }
 0x43f   :  { %1919 = vmatprep.subr.bf16.mxu0 %v2415_v58  ;;  %1951 = vmatprep.subr.bf16.mxu1 %v2469_v18 }
 0x442   :  { %1921 = vmatpush1.bf16.msra.mxu0 %v2448_v7  ;;  %1953 = vmatpush1.bf16.msra.mxu1 %v2496_v31 }
 0x443   :  { %1923 = vmatprep.subr.bf16.mxu0 %v2451_v10  ;;  %1955 = vmatprep.subr.bf16.mxu1 %v2499_v32 }
 0x446   :  { %1925 = vmatpush1.bf16.msra.mxu0 %v2484_v24  ;;  %1957 = vmatpush1.bf16.msra.mxu1 %v2518_v40 }
 0x447   :  { %1927 = vmatprep.subr.bf16.mxu0 %v2487_v27  ;;  %1959 = vmatprep.subr.bf16.mxu1 %v2521_v41 }
 0x44a   :  { %1929 = vmatpush1.bf16.msra.mxu0 %v2514_v39  ;;  %1961 = vmatpush1.bf16.msra.mxu1 %v2531_v47 }
 0x44b   :  { %1963 = vmatprep.subr.bf16.mxu0 %v2256_v4  ;;  %1995 = vmatprep.subr.bf16.mxu1 %v2308_v22 }
 0x500   :  { %v863_v35 = vpop.f32.mrb[8].mxu0  ;;  %v934_v44 = vpop.f32.mrb[8].mxu1 }
 0x501   :  { %v939_v49 = vadd.f32 %v1546_v29, %v863_v35  ;;  %v865_v50 = vpop.f32.mrb[9].mxu0  ;;  %v936_v51 = vpop.f32.mrb[9].mxu1  ;;  %v941_v63 = vadd.f32 %v1548_v60, %v934_v44  ;;  %v1555_v29 = vld [vmem:[%s2926_s0 + $0xa8] sm:$0xff] }
 0x502   :  { %v940_v53 = vadd.f32 %v1547_v34, %v865_v50  ;;  %v942_v59 = vadd.f32 %v1549_v57, %v936_v51 }
 0x503   :  { %v1550_v54 = vmul.f32 -1.442695, %v939_v49 }
 0x504   :  { %v1551_v56 = vmul.f32 -1.442695, %v940_v53  ;;  %v1552_v61 = vmul.f32 -1.442695, %v942_v59 }
 0x505   :  { %2155 = vpow2.f32 %v1550_v54 }
 0x506   :  { %2157 = vpow2.f32 %v1551_v56  ;;  %v1556_v56 = vld [vmem:[%s2926_s0 + $0xb0] sm:$0xff] }
 0x507   :  { %2159 = vpow2.f32 %v1552_v61 }
 0x508   :  { %2161 = vtanh.f32 %v941_v63 }
 0x50f   :  { %v2156_v1 = vpop.eup %2155 }
 0x510   :  { %v2158_v2 = vpop.eup %2157  ;;  %v946_v5 = vadd.f32 1.0, %v2156_v1 }
 0x511   :  { %v952_v6 = vadd.f32 1.0, %v2158_v2  ;;  %v2160_v11 = vpop.eup %2159 }
 0x512   :  { %2163 = vrcp.f32 %v946_v5  ;;  %v2162_v12 = vpop.eup %2161  ;;  %v959_v20 = vadd.f32 1.0, %v2160_v11 }
 0x513   :  { %2165 = vrcp.f32 %v952_v6 }
 0x514   :  { %2167 = vrcp.f32 %v959_v20 }
 0x51c   :  { %v2164_v13 = vpop.eup %2163 }
 0x51d   :  { %v2166_v16 = vpop.eup %2165  ;;  %v963_v19 = vmul.f32 %v2164_v13, %v2162_v12 }
 0x51e   :  { %v962_v21 = vmul.f32 %v2166_v16, %v2744_v28  ;;  %v2168_v36 = vpop.eup %2167  ;;  %v1554_v28 = vld [vmem:[%s2926_s0 + $0xa0] sm:$0xff] }
 0x520   :  { %v2797_v23 = vadd.f32 %v963_v19, %v962_v21 }
 0x522   :  { %2169 = vtanh.f32 %v2797_v23 }
 0x52c   :  { %v2170_v38 = vpop.eup %2169 }
 0x52d   :  { %v966_v43 = vmul.f32 %v2170_v38, %v2168_v36 }
 0x52f   :  { %1553 = vst [vmem:[%s2927_s2 + $0x20] sm:$0xff] %v966_v43  ;;  %1039 = vmatmul.mubr.f32.vlgmr.msra.gmra.mrb[10].mxu0 %v966_v43  ;;  %1110 = vmatmul.mubr.f32.vlgmr.msra.gmra.mrb[10].mxu1 %v966_v43 }
 0x530   :  { %1965 = vmatpush1.bf16.msra.mxu0 %v2267_v8  ;;  %1997 = vmatpush1.bf16.msra.mxu1 %v2316_v25 }
 0x531   :  { %1967 = vmatprep.subr.bf16.mxu0 %v2269_v9  ;;  %1999 = vmatprep.subr.bf16.mxu1 %v2341_v33 }
 0x532   :  { %1215 = vmatprep.mubr.f32.mxu0 %v2219_v3  ;;  %1286 = vmatprep.mubr.f32.mxu1 %v2219_v3 }
 0x534   :  { %1969 = vmatpush1.bf16.msra.mxu0 %v2285_v14  ;;  %2001 = vmatpush1.bf16.msra.mxu1 %v2352_v37 }
 0x535   :  { %1971 = vmatprep.subr.bf16.mxu0 %v2294_v17  ;;  %2003 = vmatprep.subr.bf16.mxu1 %v2376_v45 }
 0x538   :  { %1973 = vmatpush1.bf16.msra.mxu0 %v2319_v26  ;;  %2005 = vmatpush1.bf16.msra.mxu1 %v2385_v48 }
 0x539   :  { %1975 = vmatprep.subr.bf16.mxu0 %v2332_v30  ;;  %2007 = vmatprep.subr.bf16.mxu1 %v2397_v52 }
 0x53c   :  { %1977 = vmatpush1.bf16.msra.mxu0 %v2368_v42  ;;  %2009 = vmatpush1.bf16.msra.mxu1 %v2427_v62 }
 0x53d   :  { %1979 = vmatprep.subr.bf16.mxu0 %v2379_v46  ;;  %2011 = vmatprep.subr.bf16.mxu1 %v2433_v0 }
 0x540   :  { %1981 = vmatpush1.bf16.msra.mxu0 %v2406_v55  ;;  %2013 = vmatpush1.bf16.msra.mxu1 %v2463_v15 }
 0x541   :  { %1983 = vmatprep.subr.bf16.mxu0 %v2415_v58  ;;  %2015 = vmatprep.subr.bf16.mxu1 %v2469_v18 }
 0x544   :  { %1985 = vmatpush1.bf16.msra.mxu0 %v2448_v7  ;;  %2017 = vmatpush1.bf16.msra.mxu1 %v2496_v31 }
 0x545   :  { %1987 = vmatprep.subr.bf16.mxu0 %v2451_v10  ;;  %2019 = vmatprep.subr.bf16.mxu1 %v2499_v32 }
 0x548   :  { %1989 = vmatpush1.bf16.msra.mxu0 %v2484_v24  ;;  %2021 = vmatpush1.bf16.msra.mxu1 %v2518_v40 }
 0x549   :  { %1991 = vmatprep.subr.bf16.mxu0 %v2487_v27  ;;  %2023 = vmatprep.subr.bf16.mxu1 %v2521_v41 }
 0x54c   :  { %1993 = vmatpush1.bf16.msra.mxu0 %v2514_v39  ;;  %2025 = vmatpush1.bf16.msra.mxu1 %v2531_v47 }
 0x54d   :  { %2027 = vmatprep.subr.bf16.mxu0 %v2256_v4  ;;  %2059 = vmatprep.subr.bf16.mxu1 %v2308_v22  ;;  %v1557_v4 = vld [vmem:[%s2926_s0 + $0xb8] sm:$0xff] }
 0x602   :  { %v1040_v34 = vpop.f32.mrb[10].mxu0  ;;  %v1111_v35 = vpop.f32.mrb[10].mxu1 }
 0x603   :  { %v1116_v44 = vadd.f32 %v1554_v28, %v1040_v34  ;;  %v1042_v49 = vpop.f32.mrb[11].mxu0  ;;  %v1113_v50 = vpop.f32.mrb[11].mxu1  ;;  %v1118_v59 = vadd.f32 %v1556_v56, %v1111_v35 }
 0x604   :  { %v1117_v51 = vadd.f32 %v1555_v29, %v1042_v49  ;;  %v1119_v22 = vadd.f32 %v1557_v4, %v1113_v50  ;;  %v1573_v50 = vld [vmem:[%s2926_s0 + $0xf8] sm:$0xff] }
 0x605   :  { %v1558_v53 = vmul.f32 -1.442695, %v1116_v44 }
 0x606   :  { %v1559_v54 = vmul.f32 -1.442695, %v1117_v51  ;;  %v1560_v57 = vmul.f32 -1.442695, %v1119_v22 }
 0x607   :  { %2171 = vpow2.f32 %v1558_v53  ;;  %v1572_v53 = vld [vmem:[%s2926_s0 + $0xf0] sm:$0xff] }
 0x608   :  { %2173 = vpow2.f32 %v1559_v54 }
 0x609   :  { %2175 = vpow2.f32 %v1560_v57 }
 0x60a   :  { %2177 = vtanh.f32 %v1118_v59 }
 0x611   :  { %v2172_v60 = vpop.eup %2171 }
 0x612   :  { %v2174_v61 = vpop.eup %2173  ;;  %v1123_v63 = vadd.f32 1.0, %v2172_v60 }
 0x613   :  { %v1129_v1 = vadd.f32 1.0, %v2174_v61  ;;  %v2176_v2 = vpop.eup %2175 }
 0x614   :  { %2179 = vrcp.f32 %v1123_v63  ;;  %v2178_v5 = vpop.eup %2177  ;;  %v1136_v13 = vadd.f32 1.0, %v2176_v2 }
 0x615   :  { %2181 = vrcp.f32 %v1129_v1 }
 0x616   :  { %2183 = vrcp.f32 %v1136_v13 }
 0x61e   :  { %v2180_v6 = vpop.eup %2179 }
 0x61f   :  { %v2182_v11 = vpop.eup %2181  ;;  %v1140_v12 = vmul.f32 %v2180_v6, %v2178_v5 }
 0x620   :  { %v1139_v16 = vmul.f32 %v2182_v11, %v2797_v23  ;;  %v2184_v20 = vpop.eup %2183  ;;  %v1571_v23 = vld [vmem:[%s2926_s0 + $0xe8] sm:$0xff] }
 0x622   :  { %v2850_v19 = vadd.f32 %v1140_v12, %v1139_v16 }
 0x624   :  { %2185 = vtanh.f32 %v2850_v19 }
 0x62e   :  { %v2186_v21 = vpop.eup %2185 }
 0x62f   :  { %v1143_v36 = vmul.f32 %v2186_v21, %v2184_v20 }
 0x631   :  { %1561 = vst [vmem:[%s2927_s2 + $0x28] sm:$0xff] %v1143_v36  ;;  %1216 = vmatmul.mubr.f32.vlgmr.msra.gmra.mrb[12].mxu0 %v1143_v36  ;;  %1287 = vmatmul.mubr.f32.vlgmr.msra.gmra.mrb[12].mxu1 %v1143_v36 }
 0x632   :  { %2029 = vmatpush1.bf16.msra.mxu0 %v2267_v8  ;;  %2061 = vmatpush1.bf16.msra.mxu1 %v2316_v25  ;;  %v1563_v8 = vld [vmem:[%s2926_s0 + $0xc8] sm:$0xff] }
 0x633   :  { %2031 = vmatprep.subr.bf16.mxu0 %v2269_v9  ;;  %2063 = vmatprep.subr.bf16.mxu1 %v2341_v33 }
 0x634   :  { %1392 = vmatprep.mubr.f32.mxu0 %v2219_v3  ;;  %1463 = vmatprep.mubr.f32.mxu1 %v2219_v3  ;;  %v1562_v3 = vld [vmem:[%s2926_s0 + $0xc0] sm:$0xff] }
 0x636   :  { %2033 = vmatpush1.bf16.msra.mxu0 %v2285_v14  ;;  %2065 = vmatpush1.bf16.msra.mxu1 %v2352_v37 }
 0x637   :  { %2035 = vmatprep.subr.bf16.mxu0 %v2294_v17  ;;  %2067 = vmatprep.subr.bf16.mxu1 %v2376_v45 }
 0x63a   :  { %2037 = vmatpush1.bf16.msra.mxu0 %v2319_v26  ;;  %2069 = vmatpush1.bf16.msra.mxu1 %v2385_v48 }
 0x63b   :  { %2039 = vmatprep.subr.bf16.mxu0 %v2332_v30  ;;  %2071 = vmatprep.subr.bf16.mxu1 %v2397_v52 }
 0x63e   :  { %2041 = vmatpush1.bf16.msra.mxu0 %v2368_v42  ;;  %2073 = vmatpush1.bf16.msra.mxu1 %v2427_v62  ;;  %v1565_v42 = vld [vmem:[%s2926_s0 + $0xd8] sm:$0xff] }
 0x63f   :  { %2043 = vmatprep.subr.bf16.mxu0 %v2379_v46  ;;  %2075 = vmatprep.subr.bf16.mxu1 %v2433_v0  ;;  %v1564_v46 = vld [vmem:[%s2926_s0 + $0xd0] sm:$0xff] }
 0x642   :  { %2045 = vmatpush1.bf16.msra.mxu0 %v2406_v55  ;;  %2077 = vmatpush1.bf16.msra.mxu1 %v2463_v15 }
 0x643   :  { %2047 = vmatprep.subr.bf16.mxu0 %v2415_v58  ;;  %2079 = vmatprep.subr.bf16.mxu1 %v2469_v18 }
 0x646   :  { %2049 = vmatpush1.bf16.msra.mxu0 %v2448_v7  ;;  %2081 = vmatpush1.bf16.msra.mxu1 %v2496_v31 }
 0x647   :  { %2051 = vmatprep.subr.bf16.mxu0 %v2451_v10  ;;  %2083 = vmatprep.subr.bf16.mxu1 %v2499_v32 }
 0x64a   :  { %2053 = vmatpush1.bf16.msra.mxu0 %v2484_v24  ;;  %2085 = vmatpush1.bf16.msra.mxu1 %v2518_v40 }
 0x64b   :  { %2055 = vmatprep.subr.bf16.mxu0 %v2487_v27  ;;  %2087 = vmatprep.subr.bf16.mxu1 %v2521_v41 }
 0x64e   :  { %2057 = vmatpush1.bf16.msra.mxu0 %v2514_v39  ;;  %2089 = vmatpush1.bf16.msra.mxu1 %v2531_v47  ;;  %v1570_v47 = vld [vmem:[%s2926_s0 + $0xe0] sm:$0xff] }
 0x704   :  { %v1217_v9 = vpop.f32.mrb[12].mxu0  ;;  %v1288_v14 = vpop.f32.mrb[12].mxu1 }
 0x705   :  { %v1293_v17 = vadd.f32 %v1562_v3, %v1217_v9  ;;  %v1219_v25 = vpop.f32.mrb[13].mxu0  ;;  %v1290_v26 = vpop.f32.mrb[13].mxu1  ;;  %v1295_v52 = vadd.f32 %v1564_v46, %v1288_v14 }
 0x706   :  { %v1294_v30 = vadd.f32 %v1563_v8, %v1219_v25  ;;  %v1296_v45 = vadd.f32 %v1565_v42, %v1290_v26 }
 0x707   :  { %v1566_v33 = vmul.f32 -1.442695, %v1293_v17 }
 0x708   :  { %v1567_v37 = vmul.f32 -1.442695, %v1294_v30  ;;  %v1568_v48 = vmul.f32 -1.442695, %v1296_v45 }
 0x709   :  { %2187 = vpow2.f32 %v1566_v33 }
 0x70a   :  { %2189 = vpow2.f32 %v1567_v37 }
 0x70b   :  { %2191 = vpow2.f32 %v1568_v48 }
 0x70c   :  { %2193 = vtanh.f32 %v1295_v52 }
 0x713   :  { %v2188_v55 = vpop.eup %2187 }
 0x714   :  { %v2190_v58 = vpop.eup %2189  ;;  %v1300_v62 = vadd.f32 1.0, %v2188_v55 }
 0x715   :  { %v1306_v0 = vadd.f32 1.0, %v2190_v58  ;;  %v2192_v7 = vpop.eup %2191 }
 0x716   :  { %2195 = vrcp.f32 %v1300_v62  ;;  %v2194_v10 = vpop.eup %2193  ;;  %v1313_v27 = vadd.f32 1.0, %v2192_v7 }
 0x717   :  { %2197 = vrcp.f32 %v1306_v0 }
 0x718   :  { %2199 = vrcp.f32 %v1313_v27 }
 0x720   :  { %v2196_v15 = vpop.eup %2195 }
 0x721   :  { %v2198_v18 = vpop.eup %2197  ;;  %v1317_v24 = vmul.f32 %v2196_v15, %v2194_v10 }
 0x722   :  { %v1316_v31 = vmul.f32 %v2198_v18, %v2850_v19  ;;  %v2200_v39 = vpop.eup %2199 }
 0x724   :  { %v1318_v32 = vadd.f32 %v1317_v24, %v1316_v31 }
 0x726   :  { %2201 = vtanh.f32 %v1318_v32 }
 0x730   :  { %v2202_v40 = vpop.eup %2201 }
 0x731   :  { %v1320_v41 = vmul.f32 %v2202_v40, %v2200_v39 }
 0x733   :  { %1569 = vst [vmem:[%s2927_s2 + $0x30] sm:$0xff] %v1320_v41  ;;  %1393 = vmatmul.mubr.f32.vlgmr.msra.gmra.mrb[14].mxu0 %v1320_v41  ;;  %1464 = vmatmul.mubr.f32.vlgmr.msra.gmra.mrb[14].mxu1 %v1320_v41 }
 0x806   :  { %v1394_v38 = vpop.f32.mrb[14].mxu0  ;;  %v1465_v43 = vpop.f32.mrb[14].mxu1 }
 0x807   :  { %v1470_v28 = vadd.f32 %v1570_v47, %v1394_v38  ;;  %v1396_v29 = vpop.f32.mrb[15].mxu0  ;;  %v1467_v34 = vpop.f32.mrb[15].mxu1  ;;  %v1472_v4 = vadd.f32 %v1572_v53, %v1465_v43 }
 0x808   :  { %v1471_v35 = vadd.f32 %v1571_v23, %v1396_v29  ;;  %v1473_v51 = vadd.f32 %v1573_v50, %v1467_v34 }
 0x809   :  { %v1574_v44 = vmul.f32 -1.442695, %v1470_v28 }
 0x80a   :  { %v1575_v49 = vmul.f32 -1.442695, %v1471_v35  ;;  %v1576_v54 = vmul.f32 -1.442695, %v1473_v51 }
 0x80b   :  { %2203 = vpow2.f32 %v1574_v44 }
 0x80c   :  { %2205 = vpow2.f32 %v1575_v49 }
 0x80d   :  { %2207 = vpow2.f32 %v1576_v54 }
 0x80e   :  { %2209 = vtanh.f32 %v1472_v4 }
 0x815   :  { %v2204_v22 = vpop.eup %2203 }
 0x816   :  { %v2206_v56 = vpop.eup %2205  ;;  %v1477_v57 = vadd.f32 1.0, %v2204_v22 }
 0x817   :  { %v1483_v59 = vadd.f32 1.0, %v2206_v56  ;;  %v2208_v60 = vpop.eup %2207 }
 0x818   :  { %2211 = vrcp.f32 %v1477_v57  ;;  %v2210_v61 = vpop.eup %2209  ;;  %v1490_v5 = vadd.f32 1.0, %v2208_v60 }
 0x819   :  { %2213 = vrcp.f32 %v1483_v59 }
 0x81a   :  { %2215 = vrcp.f32 %v1490_v5 }
 0x822   :  { %v2212_v63 = vpop.eup %2211 }
 0x823   :  { %v2214_v1 = vpop.eup %2213  ;;  %v1494_v2 = vmul.f32 %v2212_v63, %v2210_v61 }
 0x824   :  { %v1493_v6 = vmul.f32 %v2214_v1, %v1318_v32  ;;  %v2216_v12 = vpop.eup %2215 }
 0x826   :  { %v1495_v11 = vadd.f32 %v1494_v2, %v1493_v6 }
 0x828   :  { %2217 = vtanh.f32 %v1495_v11  ;;  %1506 = vst [vmem:[%s2928_s4] sm:$0xff] %v1495_v11 }
 0x832   :  { %v2218_v13 = vpop.eup %2217 }
 0x833   :  { %v1497_v16 = vmul.f32 %v2218_v13, %v2216_v12 }
 0x835   :  { %1577 = vst [vmem:[%s2927_s2 + $0x38] sm:$0xff] %v1497_v16  ;;  %1505 = vst [vmem:[%s2929_s3] sm:$0xff] %v1497_v16 }

</bundles_post_ra>
